<compile_context>
chip_gen: v7x
topology: tpu7x:2x2x1
jax: 0.10.0
libtpu: 0.0.40
codegen_flags: <defaults>
</compile_context>

<pallas_src>
import functools
import math

import jax
import jax.numpy as jnp
from jax.experimental import pallas as pl
from jax.experimental.pallas import tpu as pltpu


# ---------------------------------------------------------------------------
# VMEM budget (generation-aware: v7x has 64 MiB physical, v5e/v6e 128 MiB)
# ---------------------------------------------------------------------------

def _vmem_limit_bytes():
    try:
        cap = pltpu.get_tpu_info().vmem_capacity_bytes
    except Exception:
        cap = 128 * 1024 * 1024
    # leave headroom for double-buffered inputs / compiler scratch
    return int(min(cap * 3 // 4, 96 * 1024 * 1024))


_VMEM_LIMIT = _vmem_limit_bytes()


def _pick_block(dim, target):
    """Largest tile <= target that exactly divides `dim`.

    Prefers `target` (256-aligned by default for v6e/v7x MXUs); falls back to
    lane-dense 128-multiples, and finally to the full dim (single block) for
    small / unaligned problem sizes like the demo config.
    """
    if dim <= target:
        return dim
    if dim % target == 0:
        return target
    for t in range(target, 127, -128):
        if dim % t == 0:
            return t
    return dim


# ---------------------------------------------------------------------------
# Kernels
# ---------------------------------------------------------------------------

def _matmul_bias_kernel(x_ref, w_ref, b_ref, o_ref, acc_ref):
    """o = x @ w + b, tiled over (M, N, K) with an f32 VMEM accumulator."""
    @pl.when(pl.program_id(2) == 0)
    def _():
        acc_ref[...] = jnp.zeros_like(acc_ref)

    acc_ref[...] += jnp.dot(x_ref[...], w_ref[...],
                            preferred_element_type=jnp.float32)

    @pl.when(pl.program_id(2) == pl.num_programs(2) - 1)
    def _():
        o_ref[...] = (acc_ref[...] + b_ref[...].astype(jnp.float32)
                      ).astype(o_ref.dtype)


def _attn_block_kernel(x_ref, qkv_ref, wo_ref, bo_ref, g_ref, b_ref, o_ref,
                       *, n_heads):
    """Fused MHA block for one batch element.

    Head split, softmax, head merge, output projection, residual add and
    LayerNorm all happen in VMEM: one HBM read of (x, qkv), one HBM write of
    the normalized result.  Scores / probabilities stay in f32; MXU inputs
    stay bf16 with f32 accumulation.
    """
    T = x_ref.shape[1]
    D = x_ref.shape[2]
    Dh = D // n_heads
    scale = 1.0 / math.sqrt(Dh)

    x = x_ref[0]          # (T, D)   residual, bf16
    qkv = qkv_ref[0]      # (T, 3D)  bf16
    wo = wo_ref[...]      # (D, D)   bf16

    # head merge fused into the output projection:  concat_h(o_h) @ Wo
    #                                            == sum_h  o_h @ Wo[h*Dh:(h+1)*Dh]
    proj = jnp.zeros((T, D), jnp.float32)
    for h in range(n_heads):                      # static unroll over heads
        qh = qkv[:, h * Dh:(h + 1) * Dh]          # (T, Dh)
        kh = qkv[:, D + h * Dh: D + (h + 1) * Dh]
        vh = qkv[:, 2 * D + h * Dh: 2 * D + (h + 1) * Dh]

        # q @ k^T without materializing the transpose
        s = jax.lax.dot_general(qh, kh, (((1,), (1,)), ((), ())),
                                preferred_element_type=jnp.float32) * scale
        s_max = jnp.max(s, axis=-1, keepdims=True)
        p = jnp.exp(s - s_max)
        denom = jnp.sum(p, axis=-1, keepdims=True)
        p = p * pl.reciprocal(denom, approx=True)       # divide on the EUP

        oh = jnp.dot(p.astype(vh.dtype), vh,
                     preferred_element_type=jnp.float32)        # (T, Dh)
        proj = proj + jnp.dot(oh.astype(wo.dtype),
                              wo[h * Dh:(h + 1) * Dh, :],
                              preferred_element_type=jnp.float32)

    proj = proj + bo_ref[...].astype(jnp.float32)

    # fused residual + LayerNorm epilogue (f32 math, eps matches torch 1e-5)
    z = x.astype(jnp.float32) + proj
    mu = jnp.mean(z, axis=-1, keepdims=True)
    var = jnp.mean((z - mu) * (z - mu), axis=-1, keepdims=True)
    y = (z - mu) * jax.lax.rsqrt(var + 1e-5)
    y = y * g_ref[...].astype(jnp.float32) + b_ref[...].astype(jnp.float32)
    o_ref[0] = y.astype(o_ref.dtype)


def _ffn_resnorm_kernel(x_ref, w1_ref, b1_ref, w2_ref, b2_ref, g_ref, b_ref,
                        o_ref):
    """Fused FFN:  LN( x + GELU(x @ W1 + b1) @ W2 + b2 )  per M-tile."""
    x = x_ref[...]                                                  # (tm, D) bf16
    h = jnp.dot(x, w1_ref[...], preferred_element_type=jnp.float32)
    h = h + b1_ref[...].astype(jnp.float32)
    h = jax.nn.gelu(h)                                              # f32 VPU/EUP
    f = jnp.dot(h.astype(w2_ref.dtype), w2_ref[...],
                preferred_element_type=jnp.float32)
    f = f + b2_ref[...].astype(jnp.float32)

    z = x.astype(jnp.float32) + f                                   # residual
    mu = jnp.mean(z, axis=-1, keepdims=True)
    var = jnp.mean((z - mu) * (z - mu), axis=-1, keepdims=True)
    y = (z - mu) * jax.lax.rsqrt(var + 1e-5)
    y = y * g_ref[...].astype(jnp.float32) + b_ref[...].astype(jnp.float32)
    o_ref[...] = y.astype(o_ref.dtype)


# ---------------------------------------------------------------------------
# Pallas wrappers
# ---------------------------------------------------------------------------

def pallas_matmul_bias(x, w, b, *, tm=256, tn=256, tk=256):
    M, K = x.shape
    _, N = w.shape
    tm = _pick_block(M, tm)
    tn = _pick_block(N, tn)
    tk = _pick_block(K, tk)
    grid = (M // tm, N // tn, K // tk)
    return pl.pallas_call(
        _matmul_bias_kernel,
        out_shape=jax.ShapeDtypeStruct((M, N), x.dtype),
        grid_spec=pltpu.PrefetchScalarGridSpec(
            num_scalar_prefetch=0,
            grid=grid,
            in_specs=[
                pl.BlockSpec((tm, tk), lambda i, j, k: (i, k)),
                pl.BlockSpec((tk, tn), lambda i, j, k: (k, j)),
                pl.BlockSpec((1, tn), lambda i, j, k: (0, j)),
            ],
            out_specs=pl.BlockSpec((tm, tn), lambda i, j, k: (i, j)),
            scratch_shapes=[pltpu.VMEM((tm, tn), jnp.float32)],
        ),
        compiler_params=pltpu.CompilerParams(
            dimension_semantics=("parallel", "parallel", "arbitrary"),
            vmem_limit_bytes=_VMEM_LIMIT),
    )(x, w, b)


def pallas_attention_block(x, qkv, wo, bo, g, b, *, n_heads):
    B, T, D = x.shape
    kernel = functools.partial(_attn_block_kernel, n_heads=n_heads)
    return pl.pallas_call(
        kernel,
        out_shape=jax.ShapeDtypeStruct((B, T, D), x.dtype),
        grid_spec=pltpu.PrefetchScalarGridSpec(
            num_scalar_prefetch=0,
            grid=(B,),
            in_specs=[
                pl.BlockSpec((1, T, D), lambda bi: (bi, 0, 0)),
                pl.BlockSpec((1, T, 3 * D), lambda bi: (bi, 0, 0)),
                pl.BlockSpec((D, D), lambda bi: (0, 0)),
                pl.BlockSpec((1, D), lambda bi: (0, 0)),
                pl.BlockSpec((1, D), lambda bi: (0, 0)),
                pl.BlockSpec((1, D), lambda bi: (0, 0)),
            ],
            out_specs=pl.BlockSpec((1, T, D), lambda bi: (bi, 0, 0)),
        ),
        compiler_params=pltpu.CompilerParams(
            dimension_semantics=("parallel",),
            vmem_limit_bytes=_VMEM_LIMIT),
    )(x, qkv, wo, bo, g, b)


def pallas_ffn_block(x2d, w1, b1, w2, b2, g, b, *, tm=256):
    M, D = x2d.shape
    F = w1.shape[1]
    tm = _pick_block(M, tm)
    return pl.pallas_call(
        _ffn_resnorm_kernel,
        out_shape=jax.ShapeDtypeStruct((M, D), x2d.dtype),
        grid_spec=pltpu.PrefetchScalarGridSpec(
            num_scalar_prefetch=0,
            grid=(M // tm,),
            in_specs=[
                pl.BlockSpec((tm, D), lambda i: (i, 0)),
                pl.BlockSpec((D, F), lambda i: (0, 0)),
                pl.BlockSpec((1, F), lambda i: (0, 0)),
                pl.BlockSpec((F, D), lambda i: (0, 0)),
                pl.BlockSpec((1, D), lambda i: (0, 0)),
                pl.BlockSpec((1, D), lambda i: (0, 0)),
                pl.BlockSpec((1, D), lambda i: (0, 0)),
            ],
            out_specs=pl.BlockSpec((tm, D), lambda i: (i, 0)),
        ),
        compiler_params=pltpu.CompilerParams(
            dimension_semantics=("parallel",),
            vmem_limit_bytes=_VMEM_LIMIT),
    )(x2d, w1, b1, w2, b2, g, b)


# ---------------------------------------------------------------------------
# Parameter init (deterministic, synthetic, bf16 storage)
# ---------------------------------------------------------------------------

def init_params(key, *, d_model, seq_len, n_layers, n_heads, d_ff,
                class_len, patch_dim):
    dt = jnp.bfloat16

    def nxt():
        nonlocal key
        key, sub = jax.random.split(key)
        return sub

    def w_init(shape, scale=0.02):
        return (jax.random.normal(nxt(), shape, jnp.float32) * scale).astype(dt)

    params = {
        "patch_embed_w": w_init((patch_dim, d_model)),
        "patch_embed_b": jnp.zeros((1, d_model), dt),
        "cls_token": jax.random.normal(nxt(), (1, 1, d_model), jnp.float32).astype(dt),
        "pos_embed": jax.random.normal(nxt(), (1, seq_len + 1, d_model), jnp.float32).astype(dt),
        "out_w": w_init((d_model, class_len)),
        "out_b": jnp.zeros((1, class_len), dt),
        "layers": [],
    }
    for _ in range(n_layers):
        layer = {
            # fused QKV weight: one (D, 3D) matmul instead of three (D, D) calls
            "wqkv": w_init((d_model, 3 * d_model)),
            "bqkv": jnp.zeros((1, 3 * d_model), dt),
            "wo": w_init((d_model, d_model)),
            "bo": jnp.zeros((1, d_model), dt),
            "ln1_g": jnp.ones((1, d_model), dt),
            "ln1_b": jnp.zeros((1, d_model), dt),
            "w1": w_init((d_model, d_ff)),
            "b1": jnp.zeros((1, d_ff), dt),
            "w2": w_init((d_ff, d_model)),
            "b2": jnp.zeros((1, d_model), dt),
            "ln2_g": jnp.ones((1, d_model), dt),
            "ln2_b": jnp.zeros((1, d_model), dt),
        }
        params["layers"].append(layer)
    return params


# ---------------------------------------------------------------------------
# Forward pass
# ---------------------------------------------------------------------------

def encoder_block(p, x, n_heads):
    B, T, D = x.shape
    # single fused QKV projection (tiled matmul kernel)
    qkv = pallas_matmul_bias(x.reshape(B * T, D), p["wqkv"], p["bqkv"])
    qkv = qkv.reshape(B, T, 3 * D)                     # free (contiguous) reshape

    # fused: attention + head merge + out-proj + residual + LayerNorm
    z = pallas_attention_block(x, qkv, p["wo"], p["bo"],
                               p["ln1_g"], p["ln1_b"], n_heads=n_heads)

    # fused: FFN + residual + LayerNorm
    z = pallas_ffn_block(z.reshape(B * T, D), p["w1"], p["b1"],
                         p["w2"], p["b2"], p["ln2_g"], p["ln2_b"])
    return z.reshape(B, T, D)


def vit_forward(params, x, *, n_heads, pre_training=False):
    B, S, P = x.shape
    d_model = params["patch_embed_w"].shape[1]
    xb = x.astype(jnp.bfloat16)

    # patch embedding (Linear patch_dim -> d_model), tiled matmul kernel
    h = pallas_matmul_bias(xb.reshape(B * S, P),
                           params["patch_embed_w"],
                           params["patch_embed_b"]).reshape(B, S, d_model)

    # prepend cls token, add positional embedding (cheap XLA glue)
    cls = jnp.broadcast_to(params["cls_token"], (B, 1, d_model))
    h = jnp.concatenate([cls, h], axis=1)                   # (B, S+1, d_model)
    pos = params["pos_embed"][:, : h.shape[1], :]
    h = (h.astype(jnp.float32) + pos.astype(jnp.float32)).astype(jnp.bfloat16)

    # encoder stack
    for layer in params["layers"]:
        h = encoder_block(layer, h, n_heads)

    # pre_training path (Ffn head) omitted — pre_training=False in this script.
    cls_repr = h[:, 0, :]                                   # (B, d_model)
    # classifier head: tiny (B,D)x(D,10) matmul — plain XLA per perf review
    logits = (jnp.dot(cls_repr.astype(jnp.float32),
                      params["out_w"].astype(jnp.float32))
              + params["out_b"].astype(jnp.float32))
    return logits                                           # (B, class_len)


# ---------------------------------------------------------------------------
# Main
# ---------------------------------------------------------------------------

if __name__ == "__main__":
    # Small config consistent with the module's constructor.
    # NOTE: real deployments should keep d_model / d_ff multiples of 128 for
    # lane-dense stores and full MXU tiles; these toy dims are for the demo.
    d_model, seq_len, n_layers, n_heads, d_ff = 32, 8, 2, 4, 64
    class_len, patch_dim, batch = 10, 48, 2

    key = jax.random.PRNGKey(0)
    pkey, xkey = jax.random.split(key)

    params = init_params(pkey, d_model=d_model, seq_len=seq_len,
                         n_layers=n_layers, n_heads=n_heads, d_ff=d_ff,
                         class_len=class_len, patch_dim=patch_dim)

    x = jax.random.normal(xkey, (batch, seq_len, patch_dim), jnp.float32)

    fwd = jax.jit(functools.partial(vit_forward, n_heads=n_heads))
    logits = fwd(params, x)
    jax.block_until_ready(logits)

    assert logits.shape == (batch, class_len), logits.shape
    print("KERNEL_OK")
</pallas_src>

<mosaic_0001>
module attributes {stable_mosaic.version = 11 : i64} {
  func.func @_matmul_bias_kernel(%arg0: i32, %arg1: i32, %arg2: i32, %arg3: memref<16x48xbf16, #tpu.memory_space<vmem>>, %arg4: memref<48x32xbf16, #tpu.memory_space<vmem>>, %arg5: memref<1x32xbf16, #tpu.memory_space<vmem>>, %arg6: memref<16x32xbf16, #tpu.memory_space<vmem>>, %arg7: memref<16x32xf32, #tpu.memory_space<vmem>>) attributes {dimension_semantics = [#tpu.dimension_semantics<parallel>, #tpu.dimension_semantics<parallel>, #tpu.dimension_semantics<arbitrary>], iteration_bounds = array<i64: 1, 1, 1>, scalar_prefetch = 0 : i64, scratch_operands = 1 : i64, tpu.core_type = #tpu.core_type<tc>, window_params = [{transform_indices = @transform_0, window_bounds = array<i64: 16, 48>}, {transform_indices = @transform_1, window_bounds = array<i64: 48, 32>}, {transform_indices = @transform_2, window_bounds = array<i64: 1, 32>}, {transform_indices = @transform_3, window_bounds = array<i64: 16, 32>}]} {
    %c0_i32 = arith.constant 0 : i32
    %0 = arith.cmpi eq, %arg2, %c0_i32 : i32
    %1 = arith.extui %0 : i1 to i32
    %c0_i32_0 = arith.constant 0 : i32
    %2 = arith.cmpi ne, %1, %c0_i32_0 : i32
    scf.if %2 {
      %cst_10 = arith.constant 0.000000e+00 : f32
      %12 = vector.broadcast %cst_10 : f32 to vector<16x32xf32>
      %c0_11 = arith.constant 0 : index
      %c0_12 = arith.constant 0 : index
      %13 = vector.load %arg7[%c0_11, %c0_12] : memref<16x32xf32, #tpu.memory_space<vmem>>, vector<16x32xf32>
      tpu.vector_store %arg7[%c0_11, %c0_12], %12 {strides = array<i32>} : memref<16x32xf32, #tpu.memory_space<vmem>>, vector<16x32xf32>,
    } else {
    }
    %c0 = arith.constant 0 : index
    %c0_1 = arith.constant 0 : index
    %3 = vector.load %arg7[%c0, %c0_1] : memref<16x32xf32, #tpu.memory_space<vmem>>, vector<16x32xf32>
    %c0_2 = arith.constant 0 : index
    %c0_3 = arith.constant 0 : index
    %4 = vector.load %arg3[%c0_2, %c0_3] : memref<16x48xbf16, #tpu.memory_space<vmem>>, vector<16x48xbf16>
    %c0_4 = arith.constant 0 : index
    %c0_5 = arith.constant 0 : index
    %5 = vector.load %arg4[%c0_4, %c0_5] : memref<48x32xbf16, #tpu.memory_space<vmem>>, vector<48x32xbf16>
    %cst = arith.constant dense<0.000000e+00> : vector<16x32xf32>
    %6 = tpu.matmul %4, %5, %cst {dimension_numbers = #tpu.dot_dimension_numbers<[1], [0], [0], [1], [0, 0, 1, 1], [], []>} : vector<16x48xbf16>, vector<48x32xbf16>, vector<16x32xf32> -> vector<16x32xf32>
    %7 = arith.addf %3, %6 : vector<16x32xf32>
    %c0_6 = arith.constant 0 : index
    %c0_7 = arith.constant 0 : index
    %8 = vector.load %arg7[%c0_6, %c0_7] : memref<16x32xf32, #tpu.memory_space<vmem>>, vector<16x32xf32>
    tpu.vector_store %arg7[%c0_6, %c0_7], %7 {strides = array<i32>} : memref<16x32xf32, #tpu.memory_space<vmem>>, vector<16x32xf32>,
    %c0_i32_8 = arith.constant 0 : i32
    %9 = arith.cmpi eq, %arg2, %c0_i32_8 : i32
    %10 = arith.extui %9 : i1 to i32
    %c0_i32_9 = arith.constant 0 : i32
    %11 = arith.cmpi ne, %10, %c0_i32_9 : i32
    scf.if %11 {
      %c0_10 = arith.constant 0 : index
      %c0_11 = arith.constant 0 : index
      %12 = vector.load %arg7[%c0_10, %c0_11] : memref<16x32xf32, #tpu.memory_space<vmem>>, vector<16x32xf32>
      %c0_12 = arith.constant 0 : index
      %c0_13 = arith.constant 0 : index
      %13 = vector.load %arg5[%c0_12, %c0_13] : memref<1x32xbf16, #tpu.memory_space<vmem>>, vector<1x32xbf16>
      %14 = arith.extf %13 : vector<1x32xbf16> to vector<1x32xf32>
      %15 = vector.broadcast %14 : vector<1x32xf32> to vector<16x32xf32>
      %16 = arith.addf %12, %15 : vector<16x32xf32>
      %17 = arith.truncf %16 : vector<16x32xf32> to vector<16x32xbf16>
      %c0_14 = arith.constant 0 : index
      %c0_15 = arith.constant 0 : index
      %18 = vector.load %arg6[%c0_14, %c0_15] : memref<16x32xbf16, #tpu.memory_space<vmem>>, vector<16x32xbf16>
      tpu.vector_store %arg6[%c0_14, %c0_15], %17 {strides = array<i32>} : memref<16x32xbf16, #tpu.memory_space<vmem>>, vector<16x32xbf16>,
    } else {
    }
    return
  }
  func.func @transform_0(%arg0: i32, %arg1: i32, %arg2: i32) -> (i32, i32) {
    %c0_i32 = arith.constant 0 : i32
    return %arg0, %arg2 : i32, i32
  }
  func.func @transform_1(%arg0: i32, %arg1: i32, %arg2: i32) -> (i32, i32) {
    %c0_i32 = arith.constant 0 : i32
    return %arg2, %arg1 : i32, i32
  }
  func.func @transform_2(%arg0: i32, %arg1: i32, %arg2: i32) -> (i32, i32) {
    %c0_i32 = arith.constant 0 : i32
    %c0_i32_0 = arith.constant 0 : i32
    return %c0_i32, %arg1 : i32, i32
  }
  func.func @transform_3(%arg0: i32, %arg1: i32, %arg2: i32) -> (i32, i32) {
    %c0_i32 = arith.constant 0 : i32
    return %arg0, %arg1 : i32, i32
  }
}

module attributes {stable_mosaic.version = 11 : i64} {
  func.func @_matmul_bias_kernel(%arg0: i32, %arg1: i32, %arg2: i32, %arg3: memref<18x32xbf16, #tpu.memory_space<vmem>>, %arg4: memref<32x96xbf16, #tpu.memory_space<vmem>>, %arg5: memref<1x96xbf16, #tpu.memory_space<vmem>>, %arg6: memref<18x96xbf16, #tpu.memory_space<vmem>>, %arg7: memref<18x96xf32, #tpu.memory_space<vmem>>) attributes {dimension_semantics = [#tpu.dimension_semantics<parallel>, #tpu.dimension_semantics<parallel>, #tpu.dimension_semantics<arbitrary>], iteration_bounds = array<i64: 1, 1, 1>, scalar_prefetch = 0 : i64, scratch_operands = 1 : i64, tpu.core_type = #tpu.core_type<tc>, window_params = [{transform_indices = @transform_0, window_bounds = array<i64: 18, 32>}, {transform_indices = @transform_1, window_bounds = array<i64: 32, 96>}, {transform_indices = @transform_2, window_bounds = array<i64: 1, 96>}, {transform_indices = @transform_3, window_bounds = array<i64: 18, 96>}]} {
    %c0_i32 = arith.constant 0 : i32
    %0 = arith.cmpi eq, %arg2, %c0_i32 : i32
    %1 = arith.extui %0 : i1 to i32
    %c0_i32_0 = arith.constant 0 : i32
    %2 = arith.cmpi ne, %1, %c0_i32_0 : i32
    scf.if %2 {
      %cst_10 = arith.constant 0.000000e+00 : f32
      %12 = vector.broadcast %cst_10 : f32 to vector<18x96xf32>
      %c0_11 = arith.constant 0 : index
      %c0_12 = arith.constant 0 : index
      %13 = vector.load %arg7[%c0_11, %c0_12] : memref<18x96xf32, #tpu.memory_space<vmem>>, vector<18x96xf32>
      tpu.vector_store %arg7[%c0_11, %c0_12], %12 {strides = array<i32>} : memref<18x96xf32, #tpu.memory_space<vmem>>, vector<18x96xf32>,
    } else {
    }
    %c0 = arith.constant 0 : index
    %c0_1 = arith.constant 0 : index
    %3 = vector.load %arg7[%c0, %c0_1] : memref<18x96xf32, #tpu.memory_space<vmem>>, vector<18x96xf32>
    %c0_2 = arith.constant 0 : index
    %c0_3 = arith.constant 0 : index
    %4 = vector.load %arg3[%c0_2, %c0_3] : memref<18x32xbf16, #tpu.memory_space<vmem>>, vector<18x32xbf16>
    %c0_4 = arith.constant 0 : index
    %c0_5 = arith.constant 0 : index
    %5 = vector.load %arg4[%c0_4, %c0_5] : memref<32x96xbf16, #tpu.memory_space<vmem>>, vector<32x96xbf16>
    %cst = arith.constant dense<0.000000e+00> : vector<18x96xf32>
    %6 = tpu.matmul %4, %5, %cst {dimension_numbers = #tpu.dot_dimension_numbers<[1], [0], [0], [1], [0, 0, 1, 1], [], []>} : vector<18x32xbf16>, vector<32x96xbf16>, vector<18x96xf32> -> vector<18x96xf32>
    %7 = arith.addf %3, %6 : vector<18x96xf32>
    %c0_6 = arith.constant 0 : index
    %c0_7 = arith.constant 0 : index
    %8 = vector.load %arg7[%c0_6, %c0_7] : memref<18x96xf32, #tpu.memory_space<vmem>>, vector<18x96xf32>
    tpu.vector_store %arg7[%c0_6, %c0_7], %7 {strides = array<i32>} : memref<18x96xf32, #tpu.memory_space<vmem>>, vector<18x96xf32>,
    %c0_i32_8 = arith.constant 0 : i32
    %9 = arith.cmpi eq, %arg2, %c0_i32_8 : i32
    %10 = arith.extui %9 : i1 to i32
    %c0_i32_9 = arith.constant 0 : i32
    %11 = arith.cmpi ne, %10, %c0_i32_9 : i32
    scf.if %11 {
      %c0_10 = arith.constant 0 : index
      %c0_11 = arith.constant 0 : index
      %12 = vector.load %arg7[%c0_10, %c0_11] : memref<18x96xf32, #tpu.memory_space<vmem>>, vector<18x96xf32>
      %c0_12 = arith.constant 0 : index
      %c0_13 = arith.constant 0 : index
      %13 = vector.load %arg5[%c0_12, %c0_13] : memref<1x96xbf16, #tpu.memory_space<vmem>>, vector<1x96xbf16>
      %14 = arith.extf %13 : vector<1x96xbf16> to vector<1x96xf32>
      %15 = vector.broadcast %14 : vector<1x96xf32> to vector<18x96xf32>
      %16 = arith.addf %12, %15 : vector<18x96xf32>
      %17 = arith.truncf %16 : vector<18x96xf32> to vector<18x96xbf16>
      %c0_14 = arith.constant 0 : index
      %c0_15 = arith.constant 0 : index
      %18 = vector.load %arg6[%c0_14, %c0_15] : memref<18x96xbf16, #tpu.memory_space<vmem>>, vector<18x96xbf16>
      tpu.vector_store %arg6[%c0_14, %c0_15], %17 {strides = array<i32>} : memref<18x96xbf16, #tpu.memory_space<vmem>>, vector<18x96xbf16>,
    } else {
    }
    return
  }
  func.func @transform_0(%arg0: i32, %arg1: i32, %arg2: i32) -> (i32, i32) {
    %c0_i32 = arith.constant 0 : i32
    return %arg0, %arg2 : i32, i32
  }
  func.func @transform_1(%arg0: i32, %arg1: i32, %arg2: i32) -> (i32, i32) {
    %c0_i32 = arith.constant 0 : i32
    return %arg2, %arg1 : i32, i32
  }
  func.func @transform_2(%arg0: i32, %arg1: i32, %arg2: i32) -> (i32, i32) {
    %c0_i32 = arith.constant 0 : i32
    %c0_i32_0 = arith.constant 0 : i32
    return %c0_i32, %arg1 : i32, i32
  }
  func.func @transform_3(%arg0: i32, %arg1: i32, %arg2: i32) -> (i32, i32) {
    %c0_i32 = arith.constant 0 : i32
    return %arg0, %arg1 : i32, i32
  }
}

module attributes {stable_mosaic.version = 11 : i64} {
  func.func @_attn_block_kernel(%arg0: i32, %arg1: memref<1x9x32xbf16, #tpu.memory_space<vmem>>, %arg2: memref<1x9x96xbf16, #tpu.memory_space<vmem>>, %arg3: memref<32x32xbf16, #tpu.memory_space<vmem>>, %arg4: memref<1x32xbf16, #tpu.memory_space<vmem>>, %arg5: memref<1x32xbf16, #tpu.memory_space<vmem>>, %arg6: memref<1x32xbf16, #tpu.memory_space<vmem>>, %arg7: memref<1x9x32xbf16, #tpu.memory_space<vmem>>) attributes {dimension_semantics = [#tpu.dimension_semantics<parallel>], iteration_bounds = array<i64: 2>, scalar_prefetch = 0 : i64, scratch_operands = 0 : i64, tpu.core_type = #tpu.core_type<tc>, window_params = [{transform_indices = @transform_0, window_bounds = array<i64: 1, 9, 32>}, {transform_indices = @transform_1, window_bounds = array<i64: 1, 9, 96>}, {pipeline_mode = #tpu.pipeline_mode<synchronous>, transform_indices = @transform_2, window_bounds = array<i64: 32, 32>}, {pipeline_mode = #tpu.pipeline_mode<synchronous>, transform_indices = @transform_3, window_bounds = array<i64: 1, 32>}, {pipeline_mode = #tpu.pipeline_mode<synchronous>, transform_indices = @transform_4, window_bounds = array<i64: 1, 32>}, {pipeline_mode = #tpu.pipeline_mode<synchronous>, transform_indices = @transform_5, window_bounds = array<i64: 1, 32>}, {transform_indices = @transform_6, window_bounds = array<i64: 1, 9, 32>}]} {
    %c0 = arith.constant 0 : index
    %c0_0 = arith.constant 0 : index
    %c0_1 = arith.constant 0 : index
    %0 = vector.load %arg1[%c0, %c0_0, %c0_1] : memref<1x9x32xbf16, #tpu.memory_space<vmem>>, vector<1x9x32xbf16>
    %1 = vector.shape_cast %0 : vector<1x9x32xbf16> to vector<9x32xbf16>
    %c0_2 = arith.constant 0 : index
    %c0_3 = arith.constant 0 : index
    %c0_4 = arith.constant 0 : index
    %2 = vector.load %arg2[%c0_2, %c0_3, %c0_4] : memref<1x9x96xbf16, #tpu.memory_space<vmem>>, vector<1x9x96xbf16>
    %3 = vector.shape_cast %2 : vector<1x9x96xbf16> to vector<9x96xbf16>
    %c0_5 = arith.constant 0 : index
    %c0_6 = arith.constant 0 : index
    %4 = vector.load %arg3[%c0_5, %c0_6] : memref<32x32xbf16, #tpu.memory_space<vmem>>, vector<32x32xbf16>
    %cst = arith.constant 0.000000e+00 : f32
    %5 = vector.broadcast %cst : f32 to vector<9x32xf32>
    %6 = vector.extract_strided_slice %3 {offsets = [0, 0], sizes = [9, 8], strides = [1, 1]} : vector<9x96xbf16> to vector<9x8xbf16>
    %7 = vector.extract_strided_slice %3 {offsets = [0, 32], sizes = [9, 8], strides = [1, 1]} : vector<9x96xbf16> to vector<9x8xbf16>
    %8 = vector.extract_strided_slice %3 {offsets = [0, 64], sizes = [9, 8], strides = [1, 1]} : vector<9x96xbf16> to vector<9x8xbf16>
    %cst_7 = arith.constant dense<0.000000e+00> : vector<9x9xf32>
    %9 = tpu.matmul %6, %7, %cst_7 {dimension_numbers = #tpu.dot_dimension_numbers<[1], [1], [0], [0], [0, 0, 1, 0], [], []>} : vector<9x8xbf16>, vector<9x8xbf16>, vector<9x9xf32> -> vector<9x9xf32>
    %cst_8 = arith.constant 0.353553385 : f32
    %10 = vector.broadcast %cst_8 : f32 to vector<9x9xf32>
    %11 = arith.mulf %9, %10 : vector<9x9xf32>
    %cst_9 = arith.constant dense<0xFF800000> : vector<9xf32>
    %12 = vector.multi_reduction <maximumf>, %11, %cst_9 [1] : vector<9x9xf32> to vector<9xf32>
    %13 = vector.shape_cast %12 : vector<9xf32> to vector<9x1xf32>
    %14 = vector.broadcast %13 : vector<9x1xf32> to vector<9x9xf32>
    %15 = arith.subf %11, %14 : vector<9x9xf32>
    %16 = math.exp %15 : vector<9x9xf32>
    %cst_10 = arith.constant dense<0.000000e+00> : vector<9xf32>
    %17 = vector.multi_reduction <add>, %16, %cst_10 [1] : vector<9x9xf32> to vector<9xf32>
    %18 = vector.shape_cast %17 : vector<9xf32> to vector<9x1xf32>
    %19 = tpu.reciprocal %18 {approx = true} : vector<9x1xf32> -> vector<9x1xf32>
    %20 = vector.broadcast %19 : vector<9x1xf32> to vector<9x9xf32>
    %21 = arith.mulf %16, %20 : vector<9x9xf32>
    %22 = arith.truncf %21 : vector<9x9xf32> to vector<9x9xbf16>
    %cst_11 = arith.constant dense<0.000000e+00> : vector<9x8xf32>
    %23 = tpu.matmul %22, %8, %cst_11 {dimension_numbers = #tpu.dot_dimension_numbers<[1], [0], [0], [1], [0, 0, 1, 1], [], []>} : vector<9x9xbf16>, vector<9x8xbf16>, vector<9x8xf32> -> vector<9x8xf32>
    %24 = arith.truncf %23 : vector<9x8xf32> to vector<9x8xbf16>
    %25 = vector.extract_strided_slice %4 {offsets = [0, 0], sizes = [8, 32], strides = [1, 1]} : vector<32x32xbf16> to vector<8x32xbf16>
    %cst_12 = arith.constant dense<0.000000e+00> : vector<9x32xf32>
    %26 = tpu.matmul %24, %25, %cst_12 {dimension_numbers = #tpu.dot_dimension_numbers<[1], [0], [0], [1], [0, 0, 1, 1], [], []>} : vector<9x8xbf16>, vector<8x32xbf16>, vector<9x32xf32> -> vector<9x32xf32>
    %27 = arith.addf %5, %26 : vector<9x32xf32>
    %28 = vector.extract_strided_slice %3 {offsets = [0, 8], sizes = [9, 8], strides = [1, 1]} : vector<9x96xbf16> to vector<9x8xbf16>
    %29 = vector.extract_strided_slice %3 {offsets = [0, 40], sizes = [9, 8], strides = [1, 1]} : vector<9x96xbf16> to vector<9x8xbf16>
    %30 = vector.extract_strided_slice %3 {offsets = [0, 72], sizes = [9, 8], strides = [1, 1]} : vector<9x96xbf16> to vector<9x8xbf16>
    %cst_13 = arith.constant dense<0.000000e+00> : vector<9x9xf32>
    %31 = tpu.matmul %28, %29, %cst_13 {dimension_numbers = #tpu.dot_dimension_numbers<[1], [1], [0], [0], [0, 0, 1, 0], [], []>} : vector<9x8xbf16>, vector<9x8xbf16>, vector<9x9xf32> -> vector<9x9xf32>
    %cst_14 = arith.constant 0.353553385 : f32
    %32 = vector.broadcast %cst_14 : f32 to vector<9x9xf32>
    %33 = arith.mulf %31, %32 : vector<9x9xf32>
    %cst_15 = arith.constant dense<0xFF800000> : vector<9xf32>
    %34 = vector.multi_reduction <maximumf>, %33, %cst_15 [1] : vector<9x9xf32> to vector<9xf32>
    %35 = vector.shape_cast %34 : vector<9xf32> to vector<9x1xf32>
    %36 = vector.broadcast %35 : vector<9x1xf32> to vector<9x9xf32>
    %37 = arith.subf %33, %36 : vector<9x9xf32>
    %38 = math.exp %37 : vector<9x9xf32>
    %cst_16 = arith.constant dense<0.000000e+00> : vector<9xf32>
    %39 = vector.multi_reduction <add>, %38, %cst_16 [1] : vector<9x9xf32> to vector<9xf32>
    %40 = vector.shape_cast %39 : vector<9xf32> to vector<9x1xf32>
    %41 = tpu.reciprocal %40 {approx = true} : vector<9x1xf32> -> vector<9x1xf32>
    %42 = vector.broadcast %41 : vector<9x1xf32> to vector<9x9xf32>
    %43 = arith.mulf %38, %42 : vector<9x9xf32>
    %44 = arith.truncf %43 : vector<9x9xf32> to vector<9x9xbf16>
    %cst_17 = arith.constant dense<0.000000e+00> : vector<9x8xf32>
    %45 = tpu.matmul %44, %30, %cst_17 {dimension_numbers = #tpu.dot_dimension_numbers<[1], [0], [0], [1], [0, 0, 1, 1], [], []>} : vector<9x9xbf16>, vector<9x8xbf16>, vector<9x8xf32> -> vector<9x8xf32>
    %46 = arith.truncf %45 : vector<9x8xf32> to vector<9x8xbf16>
    %47 = vector.extract_strided_slice %4 {offsets = [8, 0], sizes = [8, 32], strides = [1, 1]} : vector<32x32xbf16> to vector<8x32xbf16>
    %cst_18 = arith.constant dense<0.000000e+00> : vector<9x32xf32>
    %48 = tpu.matmul %46, %47, %cst_18 {dimension_numbers = #tpu.dot_dimension_numbers<[1], [0], [0], [1], [0, 0, 1, 1], [], []>} : vector<9x8xbf16>, vector<8x32xbf16>, vector<9x32xf32> -> vector<9x32xf32>
    %49 = arith.addf %27, %48 : vector<9x32xf32>
    %50 = vector.extract_strided_slice %3 {offsets = [0, 16], sizes = [9, 8], strides = [1, 1]} : vector<9x96xbf16> to vector<9x8xbf16>
    %51 = vector.extract_strided_slice %3 {offsets = [0, 48], sizes = [9, 8], strides = [1, 1]} : vector<9x96xbf16> to vector<9x8xbf16>
    %52 = vector.extract_strided_slice %3 {offsets = [0, 80], sizes = [9, 8], strides = [1, 1]} : vector<9x96xbf16> to vector<9x8xbf16>
    %cst_19 = arith.constant dense<0.000000e+00> : vector<9x9xf32>
    %53 = tpu.matmul %50, %51, %cst_19 {dimension_numbers = #tpu.dot_dimension_numbers<[1], [1], [0], [0], [0, 0, 1, 0], [], []>} : vector<9x8xbf16>, vector<9x8xbf16>, vector<9x9xf32> -> vector<9x9xf32>
    %cst_20 = arith.constant 0.353553385 : f32
    %54 = vector.broadcast %cst_20 : f32 to vector<9x9xf32>
    %55 = arith.mulf %53, %54 : vector<9x9xf32>
    %cst_21 = arith.constant dense<0xFF800000> : vector<9xf32>
    %56 = vector.multi_reduction <maximumf>, %55, %cst_21 [1] : vector<9x9xf32> to vector<9xf32>
    %57 = vector.shape_cast %56 : vector<9xf32> to vector<9x1xf32>
    %58 = vector.broadcast %57 : vector<9x1xf32> to vector<9x9xf32>
    %59 = arith.subf %55, %58 : vector<9x9xf32>
    %60 = math.exp %59 : vector<9x9xf32>
    %cst_22 = arith.constant dense<0.000000e+00> : vector<9xf32>
    %61 = vector.multi_reduction <add>, %60, %cst_22 [1] : vector<9x9xf32> to vector<9xf32>
    %62 = vector.shape_cast %61 : vector<9xf32> to vector<9x1xf32>
    %63 = tpu.reciprocal %62 {approx = true} : vector<9x1xf32> -> vector<9x1xf32>
    %64 = vector.broadcast %63 : vector<9x1xf32> to vector<9x9xf32>
    %65 = arith.mulf %60, %64 : vector<9x9xf32>
    %66 = arith.truncf %65 : vector<9x9xf32> to vector<9x9xbf16>
    %cst_23 = arith.constant dense<0.000000e+00> : vector<9x8xf32>
    %67 = tpu.matmul %66, %52, %cst_23 {dimension_numbers = #tpu.dot_dimension_numbers<[1], [0], [0], [1], [0, 0, 1, 1], [], []>} : vector<9x9xbf16>, vector<9x8xbf16>, vector<9x8xf32> -> vector<9x8xf32>
    %68 = arith.truncf %67 : vector<9x8xf32> to vector<9x8xbf16>
    %69 = vector.extract_strided_slice %4 {offsets = [16, 0], sizes = [8, 32], strides = [1, 1]} : vector<32x32xbf16> to vector<8x32xbf16>
    %cst_24 = arith.constant dense<0.000000e+00> : vector<9x32xf32>
    %70 = tpu.matmul %68, %69, %cst_24 {dimension_numbers = #tpu.dot_dimension_numbers<[1], [0], [0], [1], [0, 0, 1, 1], [], []>} : vector<9x8xbf16>, vector<8x32xbf16>, vector<9x32xf32> -> vector<9x32xf32>
    %71 = arith.addf %49, %70 : vector<9x32xf32>
    %72 = vector.extract_strided_slice %3 {offsets = [0, 24], sizes = [9, 8], strides = [1, 1]} : vector<9x96xbf16> to vector<9x8xbf16>
    %73 = vector.extract_strided_slice %3 {offsets = [0, 56], sizes = [9, 8], strides = [1, 1]} : vector<9x96xbf16> to vector<9x8xbf16>
    %74 = vector.extract_strided_slice %3 {offsets = [0, 88], sizes = [9, 8], strides = [1, 1]} : vector<9x96xbf16> to vector<9x8xbf16>
    %cst_25 = arith.constant dense<0.000000e+00> : vector<9x9xf32>
    %75 = tpu.matmul %72, %73, %cst_25 {dimension_numbers = #tpu.dot_dimension_numbers<[1], [1], [0], [0], [0, 0, 1, 0], [], []>} : vector<9x8xbf16>, vector<9x8xbf16>, vector<9x9xf32> -> vector<9x9xf32>
    %cst_26 = arith.constant 0.353553385 : f32
    %76 = vector.broadcast %cst_26 : f32 to vector<9x9xf32>
    %77 = arith.mulf %75, %76 : vector<9x9xf32>
    %cst_27 = arith.constant dense<0xFF800000> : vector<9xf32>
    %78 = vector.multi_reduction <maximumf>, %77, %cst_27 [1] : vector<9x9xf32> to vector<9xf32>
    %79 = vector.shape_cast %78 : vector<9xf32> to vector<9x1xf32>
    %80 = vector.broadcast %79 : vector<9x1xf32> to vector<9x9xf32>
    %81 = arith.subf %77, %80 : vector<9x9xf32>
    %82 = math.exp %81 : vector<9x9xf32>
    %cst_28 = arith.constant dense<0.000000e+00> : vector<9xf32>
    %83 = vector.multi_reduction <add>, %82, %cst_28 [1] : vector<9x9xf32> to vector<9xf32>
    %84 = vector.shape_cast %83 : vector<9xf32> to vector<9x1xf32>
    %85 = tpu.reciprocal %84 {approx = true} : vector<9x1xf32> -> vector<9x1xf32>
    %86 = vector.broadcast %85 : vector<9x1xf32> to vector<9x9xf32>
    %87 = arith.mulf %82, %86 : vector<9x9xf32>
    %88 = arith.truncf %87 : vector<9x9xf32> to vector<9x9xbf16>
    %cst_29 = arith.constant dense<0.000000e+00> : vector<9x8xf32>
    %89 = tpu.matmul %88, %74, %cst_29 {dimension_numbers = #tpu.dot_dimension_numbers<[1], [0], [0], [1], [0, 0, 1, 1], [], []>} : vector<9x9xbf16>, vector<9x8xbf16>, vector<9x8xf32> -> vector<9x8xf32>
    %90 = arith.truncf %89 : vector<9x8xf32> to vector<9x8xbf16>
    %91 = vector.extract_strided_slice %4 {offsets = [24, 0], sizes = [8, 32], strides = [1, 1]} : vector<32x32xbf16> to vector<8x32xbf16>
    %cst_30 = arith.constant dense<0.000000e+00> : vector<9x32xf32>
    %92 = tpu.matmul %90, %91, %cst_30 {dimension_numbers = #tpu.dot_dimension_numbers<[1], [0], [0], [1], [0, 0, 1, 1], [], []>} : vector<9x8xbf16>, vector<8x32xbf16>, vector<9x32xf32> -> vector<9x32xf32>
    %93 = arith.addf %71, %92 : vector<9x32xf32>
    %c0_31 = arith.constant 0 : index
    %c0_32 = arith.constant 0 : index
    %94 = vector.load %arg4[%c0_31, %c0_32] : memref<1x32xbf16, #tpu.memory_space<vmem>>, vector<1x32xbf16>
    %95 = arith.extf %94 : vector<1x32xbf16> to vector<1x32xf32>
    %96 = vector.broadcast %95 : vector<1x32xf32> to vector<9x32xf32>
    %97 = arith.addf %93, %96 : vector<9x32xf32>
    %98 = arith.extf %1 : vector<9x32xbf16> to vector<9x32xf32>
    %99 = arith.addf %98, %97 : vector<9x32xf32>
    %cst_33 = arith.constant dense<0.000000e+00> : vector<9xf32>
    %100 = vector.multi_reduction <add>, %99, %cst_33 [1] : vector<9x32xf32> to vector<9xf32>
    %101 = vector.shape_cast %100 : vector<9xf32> to vector<9x1xf32>
    %cst_34 = arith.constant 3.200000e+01 : f32
    %102 = vector.broadcast %cst_34 : f32 to vector<9x1xf32>
    %103 = arith.divf %101, %102 : vector<9x1xf32>
    %104 = vector.broadcast %103 : vector<9x1xf32> to vector<9x32xf32>
    %105 = arith.subf %99, %104 : vector<9x32xf32>
    %106 = vector.broadcast %103 : vector<9x1xf32> to vector<9x32xf32>
    %107 = arith.subf %99, %106 : vector<9x32xf32>
    %108 = arith.mulf %105, %107 : vector<9x32xf32>
    %cst_35 = arith.constant dense<0.000000e+00> : vector<9xf32>
    %109 = vector.multi_reduction <add>, %108, %cst_35 [1] : vector<9x32xf32> to vector<9xf32>
    %110 = vector.shape_cast %109 : vector<9xf32> to vector<9x1xf32>
    %cst_36 = arith.constant 3.200000e+01 : f32
    %111 = vector.broadcast %cst_36 : f32 to vector<9x1xf32>
    %112 = arith.divf %110, %111 : vector<9x1xf32>
    %113 = vector.broadcast %103 : vector<9x1xf32> to vector<9x32xf32>
    %114 = arith.subf %99, %113 : vector<9x32xf32>
    %cst_37 = arith.constant 9.99999974E-6 : f32
    %115 = vector.broadcast %cst_37 : f32 to vector<9x1xf32>
    %116 = arith.addf %112, %115 : vector<9x1xf32>
    %117 = math.rsqrt %116 : vector<9x1xf32>
    %118 = vector.broadcast %117 : vector<9x1xf32> to vector<9x32xf32>
    %119 = arith.mulf %114, %118 : vector<9x32xf32>
    %c0_38 = arith.constant 0 : index
    %c0_39 = arith.constant 0 : index
    %120 = vector.load %arg5[%c0_38, %c0_39] : memref<1x32xbf16, #tpu.memory_space<vmem>>, vector<1x32xbf16>
    %121 = arith.extf %120 : vector<1x32xbf16> to vector<1x32xf32>
    %122 = vector.broadcast %121 : vector<1x32xf32> to vector<9x32xf32>
    %123 = arith.mulf %119, %122 : vector<9x32xf32>
    %c0_40 = arith.constant 0 : index
    %c0_41 = arith.constant 0 : index
    %124 = vector.load %arg6[%c0_40, %c0_41] : memref<1x32xbf16, #tpu.memory_space<vmem>>, vector<1x32xbf16>
    %125 = arith.extf %124 : vector<1x32xbf16> to vector<1x32xf32>
    %126 = vector.broadcast %125 : vector<1x32xf32> to vector<9x32xf32>
    %127 = arith.addf %123, %126 : vector<9x32xf32>
    %128 = arith.truncf %127 : vector<9x32xf32> to vector<9x32xbf16>
    %c0_42 = arith.constant 0 : index
    %c0_43 = arith.constant 0 : index
    %c0_44 = arith.constant 0 : index
    %129 = vector.load %arg7[%c0_42, %c0_43, %c0_44] : memref<1x9x32xbf16, #tpu.memory_space<vmem>>, vector<1x9x32xbf16>
    %130 = vector.shape_cast %129 : vector<1x9x32xbf16> to vector<9x32xbf16>
    %131 = vector.shape_cast %128 : vector<9x32xbf16> to vector<1x9x32xbf16>
    tpu.vector_store %arg7[%c0_42, %c0_43, %c0_44], %131 {strides = array<i32>} : memref<1x9x32xbf16, #tpu.memory_space<vmem>>, vector<1x9x32xbf16>,
    return
  }
  func.func @transform_0(%arg0: i32) -> (i32, i32, i32) {
    %c0_i32 = arith.constant 0 : i32
    %c0_i32_0 = arith.constant 0 : i32
    %c0_i32_1 = arith.constant 0 : i32
    return %arg0, %c0_i32, %c0_i32_0 : i32, i32, i32
  }
  func.func @transform_1(%arg0: i32) -> (i32, i32, i32) {
    %c0_i32 = arith.constant 0 : i32
    %c0_i32_0 = arith.constant 0 : i32
    %c0_i32_1 = arith.constant 0 : i32
    return %arg0, %c0_i32, %c0_i32_0 : i32, i32, i32
  }
  func.func @transform_2(%arg0: i32) -> (i32, i32) {
    %c0_i32 = arith.constant 0 : i32
    %c0_i32_0 = arith.constant 0 : i32
    %c0_i32_1 = arith.constant 0 : i32
    return %c0_i32, %c0_i32_0 : i32, i32
  }
  func.func @transform_3(%arg0: i32) -> (i32, i32) {
    %c0_i32 = arith.constant 0 : i32
    %c0_i32_0 = arith.constant 0 : i32
    %c0_i32_1 = arith.constant 0 : i32
    return %c0_i32, %c0_i32_0 : i32, i32
  }
  func.func @transform_4(%arg0: i32) -> (i32, i32) {
    %c0_i32 = arith.constant 0 : i32
    %c0_i32_0 = arith.constant 0 : i32
    %c0_i32_1 = arith.constant 0 : i32
    return %c0_i32, %c0_i32_0 : i32, i32
  }
  func.func @transform_5(%arg0: i32) -> (i32, i32) {
    %c0_i32 = arith.constant 0 : i32
    %c0_i32_0 = arith.constant 0 : i32
    %c0_i32_1 = arith.constant 0 : i32
    return %c0_i32, %c0_i32_0 : i32, i32
  }
  func.func @transform_6(%arg0: i32) -> (i32, i32, i32) {
    %c0_i32 = arith.constant 0 : i32
    %c0_i32_0 = arith.constant 0 : i32
    %c0_i32_1 = arith.constant 0 : i32
    return %arg0, %c0_i32, %c0_i32_0 : i32, i32, i32
  }
}

module attributes {stable_mosaic.version = 11 : i64} {
  func.func @_ffn_resnorm_kernel(%arg0: i32, %arg1: memref<18x32xbf16, #tpu.memory_space<vmem>>, %arg2: memref<32x64xbf16, #tpu.memory_space<vmem>>, %arg3: memref<1x64xbf16, #tpu.memory_space<vmem>>, %arg4: memref<64x32xbf16, #tpu.memory_space<vmem>>, %arg5: memref<1x32xbf16, #tpu.memory_space<vmem>>, %arg6: memref<1x32xbf16, #tpu.memory_space<vmem>>, %arg7: memref<1x32xbf16, #tpu.memory_space<vmem>>, %arg8: memref<18x32xbf16, #tpu.memory_space<vmem>>) attributes {dimension_semantics = [#tpu.dimension_semantics<parallel>], iteration_bounds = array<i64: 1>, scalar_prefetch = 0 : i64, scratch_operands = 0 : i64, tpu.core_type = #tpu.core_type<tc>, window_params = [{transform_indices = @transform_0, window_bounds = array<i64: 18, 32>}, {pipeline_mode = #tpu.pipeline_mode<synchronous>, transform_indices = @transform_1, window_bounds = array<i64: 32, 64>}, {pipeline_mode = #tpu.pipeline_mode<synchronous>, transform_indices = @transform_2, window_bounds = array<i64: 1, 64>}, {pipeline_mode = #tpu.pipeline_mode<synchronous>, transform_indices = @transform_3, window_bounds = array<i64: 64, 32>}, {pipeline_mode = #tpu.pipeline_mode<synchronous>, transform_indices = @transform_4, window_bounds = array<i64: 1, 32>}, {pipeline_mode = #tpu.pipeline_mode<synchronous>, transform_indices = @transform_5, window_bounds = array<i64: 1, 32>}, {pipeline_mode = #tpu.pipeline_mode<synchronous>, transform_indices = @transform_6, window_bounds = array<i64: 1, 32>}, {transform_indices = @transform_7, window_bounds = array<i64: 18, 32>}]} {
    %c0 = arith.constant 0 : index
    %c0_0 = arith.constant 0 : index
    %0 = vector.load %arg1[%c0, %c0_0] : memref<18x32xbf16, #tpu.memory_space<vmem>>, vector<18x32xbf16>
    %c0_1 = arith.constant 0 : index
    %c0_2 = arith.constant 0 : index
    %1 = vector.load %arg2[%c0_1, %c0_2] : memref<32x64xbf16, #tpu.memory_space<vmem>>, vector<32x64xbf16>
    %cst = arith.constant dense<0.000000e+00> : vector<18x64xf32>
    %2 = tpu.matmul %0, %1, %cst {dimension_numbers = #tpu.dot_dimension_numbers<[1], [0], [0], [1], [0, 0, 1, 1], [], []>} : vector<18x32xbf16>, vector<32x64xbf16>, vector<18x64xf32> -> vector<18x64xf32>
    %c0_3 = arith.constant 0 : index
    %c0_4 = arith.constant 0 : index
    %3 = vector.load %arg3[%c0_3, %c0_4] : memref<1x64xbf16, #tpu.memory_space<vmem>>, vector<1x64xbf16>
    %4 = arith.extf %3 : vector<1x64xbf16> to vector<1x64xf32>
    %5 = vector.broadcast %4 : vector<1x64xf32> to vector<18x64xf32>
    %6 = arith.addf %2, %5 : vector<18x64xf32>
    %7 = arith.mulf %6, %6 : vector<18x64xf32>
    %8 = arith.mulf %6, %7 : vector<18x64xf32>
    %cst_5 = arith.constant 4.471500e-02 : f32
    %9 = vector.broadcast %cst_5 : f32 to vector<18x64xf32>
    %10 = arith.mulf %9, %8 : vector<18x64xf32>
    %11 = arith.addf %6, %10 : vector<18x64xf32>
    %cst_6 = arith.constant 0.797884583 : f32
    %12 = vector.broadcast %cst_6 : f32 to vector<18x64xf32>
    %13 = arith.mulf %12, %11 : vector<18x64xf32>
    %14 = math.tanh %13 : vector<18x64xf32>
    %cst_7 = arith.constant 1.000000e+00 : f32
    %15 = vector.broadcast %cst_7 : f32 to vector<18x64xf32>
    %16 = arith.addf %15, %14 : vector<18x64xf32>
    %cst_8 = arith.constant 5.000000e-01 : f32
    %17 = vector.broadcast %cst_8 : f32 to vector<18x64xf32>
    %18 = arith.mulf %17, %16 : vector<18x64xf32>
    %19 = arith.mulf %6, %18 : vector<18x64xf32>
    %20 = arith.truncf %19 : vector<18x64xf32> to vector<18x64xbf16>
    %c0_9 = arith.constant 0 : index
    %c0_10 = arith.constant 0 : index
    %21 = vector.load %arg4[%c0_9, %c0_10] : memref<64x32xbf16, #tpu.memory_space<vmem>>, vector<64x32xbf16>
    %cst_11 = arith.constant dense<0.000000e+00> : vector<18x32xf32>
    %22 = tpu.matmul %20, %21, %cst_11 {dimension_numbers = #tpu.dot_dimension_numbers<[1], [0], [0], [1], [0, 0, 1, 1], [], []>} : vector<18x64xbf16>, vector<64x32xbf16>, vector<18x32xf32> -> vector<18x32xf32>
    %c0_12 = arith.constant 0 : index
    %c0_13 = arith.constant 0 : index
    %23 = vector.load %arg5[%c0_12, %c0_13] : memref<1x32xbf16, #tpu.memory_space<vmem>>, vector<1x32xbf16>
    %24 = arith.extf %23 : vector<1x32xbf16> to vector<1x32xf32>
    %25 = vector.broadcast %24 : vector<1x32xf32> to vector<18x32xf32>
    %26 = arith.addf %22, %25 : vector<18x32xf32>
    %27 = arith.extf %0 : vector<18x32xbf16> to vector<18x32xf32>
    %28 = arith.addf %27, %26 : vector<18x32xf32>
    %cst_14 = arith.constant dense<0.000000e+00> : vector<18xf32>
    %29 = vector.multi_reduction <add>, %28, %cst_14 [1] : vector<18x32xf32> to vector<18xf32>
    %30 = vector.shape_cast %29 : vector<18xf32> to vector<18x1xf32>
    %cst_15 = arith.constant 3.200000e+01 : f32
    %31 = vector.broadcast %cst_15 : f32 to vector<18x1xf32>
    %32 = arith.divf %30, %31 : vector<18x1xf32>
    %33 = vector.broadcast %32 : vector<18x1xf32> to vector<18x32xf32>
    %34 = arith.subf %28, %33 : vector<18x32xf32>
    %35 = vector.broadcast %32 : vector<18x1xf32> to vector<18x32xf32>
    %36 = arith.subf %28, %35 : vector<18x32xf32>
    %37 = arith.mulf %34, %36 : vector<18x32xf32>
    %cst_16 = arith.constant dense<0.000000e+00> : vector<18xf32>
    %38 = vector.multi_reduction <add>, %37, %cst_16 [1] : vector<18x32xf32> to vector<18xf32>
    %39 = vector.shape_cast %38 : vector<18xf32> to vector<18x1xf32>
    %cst_17 = arith.constant 3.200000e+01 : f32
    %40 = vector.broadcast %cst_17 : f32 to vector<18x1xf32>
    %41 = arith.divf %39, %40 : vector<18x1xf32>
    %42 = vector.broadcast %32 : vector<18x1xf32> to vector<18x32xf32>
    %43 = arith.subf %28, %42 : vector<18x32xf32>
    %cst_18 = arith.constant 9.99999974E-6 : f32
    %44 = vector.broadcast %cst_18 : f32 to vector<18x1xf32>
    %45 = arith.addf %41, %44 : vector<18x1xf32>
    %46 = math.rsqrt %45 : vector<18x1xf32>
    %47 = vector.broadcast %46 : vector<18x1xf32> to vector<18x32xf32>
    %48 = arith.mulf %43, %47 : vector<18x32xf32>
    %c0_19 = arith.constant 0 : index
    %c0_20 = arith.constant 0 : index
    %49 = vector.load %arg6[%c0_19, %c0_20] : memref<1x32xbf16, #tpu.memory_space<vmem>>, vector<1x32xbf16>
    %50 = arith.extf %49 : vector<1x32xbf16> to vector<1x32xf32>
    %51 = vector.broadcast %50 : vector<1x32xf32> to vector<18x32xf32>
    %52 = arith.mulf %48, %51 : vector<18x32xf32>
    %c0_21 = arith.constant 0 : index
    %c0_22 = arith.constant 0 : index
    %53 = vector.load %arg7[%c0_21, %c0_22] : memref<1x32xbf16, #tpu.memory_space<vmem>>, vector<1x32xbf16>
    %54 = arith.extf %53 : vector<1x32xbf16> to vector<1x32xf32>
    %55 = vector.broadcast %54 : vector<1x32xf32> to vector<18x32xf32>
    %56 = arith.addf %52, %55 : vector<18x32xf32>
    %57 = arith.truncf %56 : vector<18x32xf32> to vector<18x32xbf16>
    %c0_23 = arith.constant 0 : index
    %c0_24 = arith.constant 0 : index
    %58 = vector.load %arg8[%c0_23, %c0_24] : memref<18x32xbf16, #tpu.memory_space<vmem>>, vector<18x32xbf16>
    tpu.vector_store %arg8[%c0_23, %c0_24], %57 {strides = array<i32>} : memref<18x32xbf16, #tpu.memory_space<vmem>>, vector<18x32xbf16>,
    return
  }
  func.func @transform_0(%arg0: i32) -> (i32, i32) {
    %c0_i32 = arith.constant 0 : i32
    %c0_i32_0 = arith.constant 0 : i32
    return %arg0, %c0_i32 : i32, i32
  }
  func.func @transform_1(%arg0: i32) -> (i32, i32) {
    %c0_i32 = arith.constant 0 : i32
    %c0_i32_0 = arith.constant 0 : i32
    %c0_i32_1 = arith.constant 0 : i32
    return %c0_i32, %c0_i32_0 : i32, i32
  }
  func.func @transform_2(%arg0: i32) -> (i32, i32) {
    %c0_i32 = arith.constant 0 : i32
    %c0_i32_0 = arith.constant 0 : i32
    %c0_i32_1 = arith.constant 0 : i32
    return %c0_i32, %c0_i32_0 : i32, i32
  }
  func.func @transform_3(%arg0: i32) -> (i32, i32) {
    %c0_i32 = arith.constant 0 : i32
    %c0_i32_0 = arith.constant 0 : i32
    %c0_i32_1 = arith.constant 0 : i32
    return %c0_i32, %c0_i32_0 : i32, i32
  }
  func.func @transform_4(%arg0: i32) -> (i32, i32) {
    %c0_i32 = arith.constant 0 : i32
    %c0_i32_0 = arith.constant 0 : i32
    %c0_i32_1 = arith.constant 0 : i32
    return %c0_i32, %c0_i32_0 : i32, i32
  }
  func.func @transform_5(%arg0: i32) -> (i32, i32) {
    %c0_i32 = arith.constant 0 : i32
    %c0_i32_0 = arith.constant 0 : i32
    %c0_i32_1 = arith.constant 0 : i32
    return %c0_i32, %c0_i32_0 : i32, i32
  }
  func.func @transform_6(%arg0: i32) -> (i32, i32) {
    %c0_i32 = arith.constant 0 : i32
    %c0_i32_0 = arith.constant 0 : i32
    %c0_i32_1 = arith.constant 0 : i32
    return %c0_i32, %c0_i32_0 : i32, i32
  }
  func.func @transform_7(%arg0: i32) -> (i32, i32) {
    %c0_i32 = arith.constant 0 : i32
    %c0_i32_0 = arith.constant 0 : i32
    return %arg0, %c0_i32 : i32, i32
  }
}

</mosaic_0001>

<bundles_post_ra>
// kernel: vit_forward.8
= control target key start
LH: loop header
LB: loop body
LE: loop exit
PB: predicated region body
PF: predicated region fallthrough
CT: control target
= control target key end

     0   :  { %8 = vsyncpa [#allocation4], 0  ;;  %s434_s0 = inlined_call_operand.hbm [shape: bf16[18,32], index: 0, kind: input, shape index: {}]   ;;  %s435_s1 = inlined_call_operand.hbm [shape: bf16[32,96], index: 1, kind: input, shape index: {}]   ;;  %s436_s2 = inlined_call_operand.hbm [shape: bf16[1,96], index: 2, kind: input, shape index: {}]   ;;  %s437_s3 = inlined_call_operand.hbm [shape: bf16[18,96], index: 3, kind: output, shape index: {}]  }
   0x1   :  { %9 = vsyncpa [#allocation7], 0 }
   0x2   :  { %10 = vsyncpa [#allocation5], 0  ;;  %s337_s12 = smov [#allocation6]   ;;  %s338_s14 = smov [#allocation3]  }
   0x3   :  { %s28_s13 = sshll.u32 %s337_s12, 4  ;;  %s16_s15 = sshll.u32 %s338_s14, 4  ;;  %s29_s13 = int_to_ptr.vmem [resolvable:$true] %s28_s13  ;;  %s364_s15 = int_to_ptr.vmem [resolvable:$true] %s16_s15 }
   0x4   :  { %s243_s18 = scalar_lea.hbm %s435_s1, 256 }
   0x5   :  { %p244_p0 = scmp.ne.s32.totalorder %s435_s1, %s243_s18  ;;  %p247_p1 = scmp.lt.u32.totalorder %s243_s18, %s435_s1 }
   0x7   :  { %p249_p2 = pnand %p247_p1, %p244_p0 }
   0x9   :  { %252 = shalt.err (!%p249_p2)
}
   0xa   :  { %s253_s23 = scalar_lea.vmem %s29_s13, 256  ;;  %p258_p4 = scmp.lt.s32.totalorder %s29_s13, %s29_s13 }
   0xb   :  { %p254_p3 = scmp.ne.s32.totalorder %s29_s13, %s253_s23  ;;  %p259_p5 = scmp.lt.s32.totalorder %s253_s23, %s253_s23 }
   0xd   :  { %p260_p6 = por %p259_p5, %p258_p4 }
   0xf   :  { %p261_p7 = pnand %p260_p6, %p254_p3 }
  0x11   :  { %264 = shalt.err (!%p261_p7)
}
  0x12   :  { %s339_s24 = smov 64   ;;  %s340_s25 = smov 4  }
  0x13   :  { %34 = dma.hbm_to_vmem [thread:$0]  %s435_s1, 256, %s29_s13, [#allocation7], %s339_s24, %s339_s24, %s340_s25  }
  0x14   :  { %s265_s30 = scalar_lea.hbm %s434_s0, 192 }
  0x15   :  { %p266_p8 = scmp.ne.s32.totalorder %s434_s0, %s265_s30  ;;  %p269_p9 = scmp.lt.u32.totalorder %s265_s30, %s434_s0 }
  0x17   :  { %p271_p10 = pnand %p269_p9, %p266_p8 }
  0x19   :  { %274 = shalt.err (!%p271_p10)
}
  0x1a   :  { %s275_s8 = scalar_lea.vmem %s364_s15, 192  ;;  %p280_p12 = scmp.lt.s32.totalorder %s364_s15, %s364_s15 }
  0x1b   :  { %p276_p11 = scmp.ne.s32.totalorder %s364_s15, %s275_s8  ;;  %p281_p13 = scmp.lt.s32.totalorder %s275_s8, %s275_s8 }
  0x1d   :  { %p282_p0 = por %p281_p13, %p280_p12 }
  0x1f   :  { %p283_p1 = pnand %p282_p0, %p276_p11 }
  0x21   :  { %286 = shalt.err (!%p283_p1)
}
  0x22   :  { %22 = dma.hbm_to_vmem [thread:$0]  %s434_s0, 192, %s364_s15, [#allocation4], %s339_s24, %s339_s24, %s340_s25  }
  0x23   :  { %s341_s10 = smov [#allocation8]   ;;  %s287_s14 = scalar_lea.hbm %s436_s2, 16 }
  0x24   :  { %s41_s11 = sshll.u32 %s341_s10, 4  ;;  %p288_p2 = scmp.ne.s32.totalorder %s436_s2, %s287_s14  ;;  %s42_s11 = int_to_ptr.vmem [resolvable:$true] %s41_s11 }
  0x25   :  { %p291_p3 = scmp.lt.u32.totalorder %s287_s14, %s436_s2 }
  0x27   :  { %p293_p4 = pnand %p291_p3, %p288_p2 }
  0x29   :  { %296 = shalt.err (!%p293_p4)
}
  0x2a   :  { %s297_s20 = scalar_lea.vmem %s42_s11, 16  ;;  %s301_s0 = scalar_lea.vmem %s42_s11, 32 }
  0x2b   :  { %p298_p5 = scmp.ne.s32.totalorder %s42_s11, %s297_s20  ;;  %p302_p6 = scmp.lt.s32.totalorder %s42_s11, %s42_s11 }
  0x2c   :  { %p303_p7 = scmp.lt.s32.totalorder %s301_s0, %s297_s20 }
  0x2e   :  { %p304_p8 = por %p303_p7, %p302_p6 }
  0x30   :  { %p305_p9 = pnand %p304_p8, %p298_p5 }
  0x32   :  { %308 = shalt.err (!%p305_p9)
}
  0x33   :  { %44 = dma.hbm_to_vmem [thread:$0]  %s436_s2, 16, %s42_s11, [#allocation7]  }
  0x34   :  { %331 = dma.done.wait [#allocation4], 192  }
  0x35   :  { %332 = vsyncadd [#allocation4], 4294967104 }
  0x36   :  { %333 = dma.done.wait [#allocation7], 272  }
  0x37   :  { %334 = vsyncadd [#allocation7], 4294967024  ;;  %vm62_vm0 = vcmask 779264   ;;  %v342_v0 = vmov 0.0   ;;  %v239_v1 = vld [vmem:[#allocation6] sm:$0xff]   ;;  %v240_v2 = vld [vmem:[#allocation6 + $0x8] sm:$0xff]   ;;  %v165_v5 = vlaneseq }
  0x38   :  { %63 = vst.msk [vmem:[#allocation2 + $0x10] sm:$0x3] %vm62_vm0, %v342_v0  ;;  %vm94_vm1 = vcmask 261120   ;;  %224 = vmatprep.subr.bf16.mxu0 %v239_v1  ;;  %v241_v3 = vld [vmem:[#allocation3] sm:$0xff]   ;;  %vm59_vm2 = vcmask 785408   ;;  %vm188_vm3 = vcmask 778240  }
  0x39   :  { %225 = vmatpush3.bf16.msra.mxu0 %v239_v1  ;;  %228 = vmatprep.mubr.msk.bf16.mxu0 %vm94_vm1, %v241_v3  ;;  %v242_v4 = vld [vmem:[#allocation3 + $0x8] ss:$0 sps:$4 sm:$0x11]   ;;  %60 = vst.msk [vmem:[#allocation2] sm:$0xff] %vm59_vm2, %v342_v0  ;;  %61 = vst.msk [vmem:[#allocation2 + $0x8] sm:$0xff] %vm59_vm2, %v342_v0  ;;  %v166_v8 = vshrl.u32 %v165_v5, 7 }
  0x3a   :  { %226 = vmatprep.subr.bf16.mxu0 %v240_v2  ;;  %v163_v10 = vld [vmem:[#allocation8] sm:$0x1]  ;;  %vm185_vm4 = vcmask 781312   ;;  %s343_s2 = smov [#allocation9]  }
  0x3b   :  { %v164_v17 = vunpack.c.l.bf16 %v163_v10  ;;  %v167_v18 = vsub.s32 0, %v166_v8  ;;  %s195_s22 = sshll.u32 %s343_s2, 4  ;;  %s196_s22 = int_to_ptr.vmem [resolvable:$true] %s195_s22 }
  0x3c   :  { %s309_s23 = scalar_lea.vmem %s196_s22, 192  ;;  %p314_p11 = scmp.lt.s32.totalorder %s196_s22, %s196_s22 }
  0x3d   :  { %227 = vmatpush3.bf16.msra.mxu0 %v240_v2  ;;  %v168_v20 = vrot.slane %v164_v17, %v167_v18  ;;  %p310_p10 = scmp.ne.s32.totalorder %s196_s22, %s309_s23  ;;  %p315_p12 = scmp.lt.s32.totalorder %s309_s23, %s309_s23 }
  0x3f   :  { %v66_v6 = vld [vmem:[#allocation2 + $0x10] sm:$0x3]  ;;  %p316_p13 = por %p315_p12, %p314_p11 }
  0x40   :  { %229 = vmatmul.mubr.msk.bf16.vlgmr.msra.gmra.mrb[0].mxu0 %vm94_vm1, %v242_v4  ;;  %v64_v7 = vld [vmem:[#allocation2] sm:$0xff]  ;;  %v65_v13 = vld [vmem:[#allocation2 + $0x8] sm:$0xff] }
  0x41   :  { %p317_p0 = pnand %p316_p13, %p310_p10 }
 0x113   :  { %v230_v9 = vpop.f32.mrb[0].mxu0 }
 0x114   :  { %v151_v11 = vadd.f32 %v230_v9, %v66_v6  ;;  %v135_v12 = vpop.f32.mrb[1].mxu0 }
 0x115   :  { %v149_v14 = vadd.f32 %v135_v12, %v64_v7  ;;  %v231_v15 = vpop.f32.mrb[2].mxu0 }
 0x116   :  { %156 = vst.msk [vmem:[#allocation2 + $0x10] sm:$0x3] %vm62_vm0, %v151_v11  ;;  %v138_v16 = vpop.f32.mrb[3].mxu0 }
 0x117   :  { %153 = vst.msk [vmem:[#allocation2] sm:$0xff] %vm59_vm2, %v149_v14  ;;  %v150_v19 = vadd.f32 %v138_v16, %v65_v13 }
 0x119   :  { %154 = vst.msk [vmem:[#allocation2 + $0x8] sm:$0xff] %vm59_vm2, %v150_v19 }
 0x11d   :  { %v162_v21 = vld [vmem:[#allocation2 + $0x10] sm:$0x3] }
 0x11e   :  { %v160_v22 = vld [vmem:[#allocation2] sm:$0xff]  ;;  %v171_v23 = vadd.f32 %v168_v20, %v162_v21 }
 0x11f   :  { %v169_v24 = vadd.f32 %v168_v20, %v160_v22 }
 0x120   :  { %v161_v25 = vld [vmem:[#allocation2 + $0x8] sm:$0xff]  ;;  %v219_v26 = vpack.c.bf16 %v171_v23, %v171_v23 }
 0x121   :  { %v170_v27 = vadd.f32 %v168_v20, %v161_v25  ;;  %v217_v28 = vpack.c.bf16 %v169_v24, %v169_v24 }
 0x122   :  { %189 = vst.msk [vmem:[#allocation9 + $0x8] sm:$0x1] %vm188_vm3, %v219_v26 }
 0x123   :  { %v218_v29 = vpack.c.bf16 %v170_v27, %v170_v27  ;;  %186 = vst.msk [vmem:[#allocation9] sm:$0xf] %vm185_vm4, %v217_v28 }
 0x125   :  { %187 = vst.msk [vmem:[#allocation9 + $0x4] sm:$0xf] %vm185_vm4, %v218_v29 }
 0x126   :  { %320 = shalt.err (!%p317_p0)
}
 0x127   :  { %s321_s28 = scalar_lea.hbm %s437_s3, 192 }
 0x128   :  { %p322_p1 = scmp.ne.s32.totalorder %s437_s3, %s321_s28  ;;  %p325_p2 = scmp.lt.u32.totalorder %s321_s28, %s437_s3 }
 0x12a   :  { %p327_p3 = pnand %p325_p2, %p322_p1 }
 0x12c   :  { %330 = shalt.err (!%p327_p3)
}
 0x12d   :  { %201 = dma.vmem_to_hbm [thread:$0]  %s196_s22, 192, %s437_s3, [#allocation5], %s339_s24, %s339_s24, %s340_s25  }
 0x12e   :  { %335 = dma.done.wait [#allocation5], 192  }
 0x12f   :  { %336 = vsyncadd [#allocation5], 4294967104 }
 0x130   :  { %205 = vsyncpa [#allocation4], 1 }
 0x131   :  { %206 = vsyncpa [#allocation7], 1 }
 0x132   :  { %207 = vsyncpa [#allocation5], 1 }

// kernel: vit_forward.7
= control target key start
LH: loop header
LB: loop body
LE: loop exit
PB: predicated region body
PF: predicated region fallthrough
CT: control target
= control target key end

     0   :  { %8 = vsyncpa [#allocation4], 0  ;;  %s412_s0 = inlined_call_operand.hbm [shape: bf16[16,48], index: 0, kind: input, shape index: {}]   ;;  %s413_s1 = inlined_call_operand.hbm [shape: bf16[48,32], index: 1, kind: input, shape index: {}]   ;;  %s414_s2 = inlined_call_operand.hbm [shape: bf16[1,32], index: 2, kind: input, shape index: {}]   ;;  %s415_s3 = inlined_call_operand.hbm [shape: bf16[16,32], index: 3, kind: output, shape index: {}]  }
   0x1   :  { %9 = vsyncpa [#allocation7], 0 }
   0x2   :  { %10 = vsyncpa [#allocation5], 0  ;;  %s316_s12 = smov [#allocation6]   ;;  %s317_s14 = smov [#allocation3]  }
   0x3   :  { %s28_s13 = sshll.u32 %s316_s12, 4  ;;  %s16_s15 = sshll.u32 %s317_s14, 4  ;;  %s29_s13 = int_to_ptr.vmem [resolvable:$true] %s28_s13  ;;  %s344_s15 = int_to_ptr.vmem [resolvable:$true] %s16_s15 }
   0x4   :  { %s222_s18 = scalar_lea.hbm %s413_s1, 384 }
   0x5   :  { %p223_p0 = scmp.ne.s32.totalorder %s413_s1, %s222_s18  ;;  %p226_p1 = scmp.lt.u32.totalorder %s222_s18, %s413_s1 }
   0x7   :  { %p228_p2 = pnand %p226_p1, %p223_p0 }
   0x9   :  { %231 = shalt.err (!%p228_p2)
}
   0xa   :  { %s232_s23 = scalar_lea.vmem %s29_s13, 384  ;;  %p237_p4 = scmp.lt.s32.totalorder %s29_s13, %s29_s13 }
   0xb   :  { %p233_p3 = scmp.ne.s32.totalorder %s29_s13, %s232_s23  ;;  %p238_p5 = scmp.lt.s32.totalorder %s232_s23, %s232_s23 }
   0xd   :  { %p239_p6 = por %p238_p5, %p237_p4 }
   0xf   :  { %p240_p7 = pnand %p239_p6, %p233_p3 }
  0x11   :  { %243 = shalt.err (!%p240_p7)
}
  0x12   :  { %s318_s24 = smov 64   ;;  %s319_s25 = smov 4  }
  0x13   :  { %34 = dma.hbm_to_vmem [thread:$0]  %s413_s1, 384, %s29_s13, [#allocation7], %s318_s24, %s318_s24, %s319_s25  }
  0x14   :  { %s244_s30 = scalar_lea.hbm %s412_s0, 128 }
  0x15   :  { %p245_p8 = scmp.ne.s32.totalorder %s412_s0, %s244_s30  ;;  %p248_p9 = scmp.lt.u32.totalorder %s244_s30, %s412_s0 }
  0x17   :  { %p250_p10 = pnand %p248_p9, %p245_p8 }
  0x19   :  { %253 = shalt.err (!%p250_p10)
}
  0x1a   :  { %s254_s8 = scalar_lea.vmem %s344_s15, 128  ;;  %p259_p12 = scmp.lt.s32.totalorder %s344_s15, %s344_s15 }
  0x1b   :  { %p255_p11 = scmp.ne.s32.totalorder %s344_s15, %s254_s8  ;;  %p260_p13 = scmp.lt.s32.totalorder %s254_s8, %s254_s8 }
  0x1d   :  { %p261_p0 = por %p260_p13, %p259_p12 }
  0x1f   :  { %p262_p1 = pnand %p261_p0, %p255_p11 }
  0x21   :  { %265 = shalt.err (!%p262_p1)
}
  0x22   :  { %22 = dma.hbm_to_vmem [thread:$0]  %s412_s0, 128, %s344_s15, [#allocation4], %s318_s24, %s318_s24, %s319_s25  }
  0x23   :  { %s320_s10 = smov [#allocation8]   ;;  %s266_s14 = scalar_lea.hbm %s414_s2, 16 }
  0x24   :  { %s41_s11 = sshll.u32 %s320_s10, 4  ;;  %p267_p2 = scmp.ne.s32.totalorder %s414_s2, %s266_s14  ;;  %s42_s11 = int_to_ptr.vmem [resolvable:$true] %s41_s11 }
  0x25   :  { %p270_p3 = scmp.lt.u32.totalorder %s266_s14, %s414_s2 }
  0x27   :  { %p272_p4 = pnand %p270_p3, %p267_p2 }
  0x29   :  { %275 = shalt.err (!%p272_p4)
}
  0x2a   :  { %s276_s20 = scalar_lea.vmem %s42_s11, 16  ;;  %s280_s0 = scalar_lea.vmem %s42_s11, 32 }
  0x2b   :  { %p277_p5 = scmp.ne.s32.totalorder %s42_s11, %s276_s20  ;;  %p281_p6 = scmp.lt.s32.totalorder %s42_s11, %s42_s11 }
  0x2c   :  { %p282_p7 = scmp.lt.s32.totalorder %s280_s0, %s276_s20 }
  0x2e   :  { %p283_p8 = por %p282_p7, %p281_p6 }
  0x30   :  { %p284_p9 = pnand %p283_p8, %p277_p5 }
  0x32   :  { %287 = shalt.err (!%p284_p9)
}
  0x33   :  { %44 = dma.hbm_to_vmem [thread:$0]  %s414_s2, 16, %s42_s11, [#allocation7]  }
  0x34   :  { %310 = dma.done.wait [#allocation4], 128  }
  0x35   :  { %311 = vsyncadd [#allocation4], 4294967168 }
  0x36   :  { %312 = dma.done.wait [#allocation7], 400  }
  0x37   :  { %313 = vsyncadd [#allocation7], 4294966896  ;;  %vm59_vm0 = vcmask 261120   ;;  %v321_v0 = vmov 0.0   ;;  %vm322_vm1 = vmmov 0   ;;  %v218_v1 = vld [vmem:[#allocation6] sm:$0xff]   ;;  %v152_v5 = vlaneseq }
  0x38   :  { %200 = vmatprep.subr.bf16.mxu0 %v321_v0  ;;  %206 = vmatprep.mubr.msk.bf16.mxu0 %vm322_vm1, %v321_v0  ;;  %60 = vst.msk [vmem:[#allocation2] sm:$0xff] %vm59_vm0, %v321_v0  ;;  %61 = vst.msk [vmem:[#allocation2 + $0x8] sm:$0xff] %vm59_vm0, %v321_v0  ;;  %v219_v2 = vld [vmem:[#allocation6 + $0x8] sm:$0xff]   ;;  %v220_v3 = vld [vmem:[#allocation6 + $0x10] sm:$0xff]   ;;  %vm95_vm2 = vcmask 392192   ;;  %vm166_vm3 = vcmask 257024  }
  0x39   :  { %201 = vmatpush3.bf16.msra.mxu0 %v218_v1  ;;  %v221_v4 = vld [vmem:[#allocation3] sm:$0xff]   ;;  %v153_v7 = vshrl.u32 %v152_v5, 7  ;;  %s323_s2 = smov [#allocation9]  }
  0x3a   :  { %202 = vmatprep.subr.bf16.mxu0 %v321_v0  ;;  %v150_v10 = vld [vmem:[#allocation8] sm:$0x1]  ;;  %s174_s22 = sshll.u32 %s323_s2, 4  ;;  %s175_s22 = int_to_ptr.vmem [resolvable:$true] %s174_s22 }
  0x3b   :  { %v151_v16 = vunpack.c.l.bf16 %v150_v10  ;;  %v154_v17 = vsub.s32 0, %v153_v7  ;;  %s288_s23 = scalar_lea.vmem %s175_s22, 128  ;;  %p293_p11 = scmp.lt.s32.totalorder %s175_s22, %s175_s22 }
  0x3c   :  { %p289_p10 = scmp.ne.s32.totalorder %s175_s22, %s288_s23  ;;  %p294_p12 = scmp.lt.s32.totalorder %s288_s23, %s288_s23 }
  0x3d   :  { %203 = vmatpush3.bf16.msra.mxu0 %v219_v2  ;;  %v155_v18 = vrot.slane %v151_v16, %v154_v17 }
  0x3e   :  { %204 = vmatprep.subr.bf16.mxu0 %v321_v0  ;;  %p295_p13 = por %p294_p12, %p293_p11 }
  0x3f   :  { %v62_v6 = vld [vmem:[#allocation2] sm:$0xff]  ;;  %v63_v9 = vld [vmem:[#allocation2 + $0x8] sm:$0xff] }
  0x40   :  { %p296_p0 = pnand %p295_p13, %p289_p10 }
  0x41   :  { %205 = vmatpush3.bf16.msra.mxu0 %v220_v3 }
  0x44   :  { %207 = vmatmul.mubr.msk.bf16.vlgmr.msra.gmra.mrb[0].mxu0 %vm95_vm2, %v221_v4 }
 0x117   :  { %v133_v8 = vpop.f32.mrb[0].mxu0 }
 0x118   :  { %v140_v11 = vadd.f32 %v133_v8, %v62_v6  ;;  %v208_v12 = vpop.f32.mrb[1].mxu0 }
 0x119   :  { %v136_v13 = vpop.f32.mrb[2].mxu0 }
 0x11a   :  { %143 = vst.msk [vmem:[#allocation2] sm:$0xff] %vm59_vm0, %v140_v11  ;;  %v141_v14 = vadd.f32 %v136_v13, %v63_v9  ;;  %v209_v15 = vpop.f32.mrb[3].mxu0 }
 0x11c   :  { %144 = vst.msk [vmem:[#allocation2 + $0x8] sm:$0xff] %vm59_vm0, %v141_v14 }
 0x121   :  { %v148_v19 = vld [vmem:[#allocation2] sm:$0xff] }
 0x122   :  { %v156_v20 = vadd.f32 %v155_v18, %v148_v19 }
 0x123   :  { %v149_v21 = vld [vmem:[#allocation2 + $0x8] sm:$0xff] }
 0x124   :  { %v157_v22 = vadd.f32 %v155_v18, %v149_v21  ;;  %v194_v23 = vpack.c.bf16 %v156_v20, %v156_v20 }
 0x126   :  { %v195_v24 = vpack.c.bf16 %v157_v22, %v157_v22  ;;  %167 = vst.msk [vmem:[#allocation9] sm:$0xf] %vm166_vm3, %v194_v23 }
 0x128   :  { %168 = vst.msk [vmem:[#allocation9 + $0x4] sm:$0xf] %vm166_vm3, %v195_v24 }
 0x129   :  { %299 = shalt.err (!%p296_p0)
}
 0x12a   :  { %s300_s28 = scalar_lea.hbm %s415_s3, 128 }
 0x12b   :  { %p301_p1 = scmp.ne.s32.totalorder %s415_s3, %s300_s28  ;;  %p304_p2 = scmp.lt.u32.totalorder %s300_s28, %s415_s3 }
 0x12d   :  { %p306_p3 = pnand %p304_p2, %p301_p1 }
 0x12f   :  { %309 = shalt.err (!%p306_p3)
}
 0x130   :  { %180 = dma.vmem_to_hbm [thread:$0]  %s175_s22, 128, %s415_s3, [#allocation5], %s318_s24, %s318_s24, %s319_s25  }
 0x131   :  { %314 = dma.done.wait [#allocation5], 128  }
 0x132   :  { %315 = vsyncadd [#allocation5], 4294967168 }
 0x133   :  { %184 = vsyncpa [#allocation4], 1 }
 0x134   :  { %185 = vsyncpa [#allocation7], 1 }
 0x135   :  { %186 = vsyncpa [#allocation5], 1 }

// kernel: vit_forward.10
= control target key start
LH: loop header
LB: loop body
LE: loop exit
PB: predicated region body
PF: predicated region fallthrough
CT: control target
= control target key end

     0   :  { %12 = vsyncpa [#allocation3], 0  ;;  %s889_s0 = inlined_call_operand.hbm [shape: bf16[18,32], index: 0, kind: input, shape index: {}]   ;;  %s890_s1 = inlined_call_operand.hbm [shape: bf16[32,64], index: 1, kind: input, shape index: {}]   ;;  %s891_s2 = inlined_call_operand.hbm [shape: bf16[1,64], index: 2, kind: input, shape index: {}]   ;;  %s892_s3 = inlined_call_operand.hbm [shape: bf16[64,32], index: 3, kind: input, shape index: {}]   ;;  %s893_s4 = inlined_call_operand.hbm [shape: bf16[1,32], index: 4, kind: input, shape index: {}]   ;;  %s894_s5 = inlined_call_operand.hbm [shape: bf16[1,32], index: 5, kind: input, shape index: {}]   ;;  %s895_s6 = inlined_call_operand.hbm [shape: bf16[1,32], index: 6, kind: input, shape index: {}]   ;;  %s896_s7 = inlined_call_operand.hbm [shape: bf16[18,32], index: 7, kind: output, shape index: {}]  }
   0x1   :  { %13 = vsyncpa [#allocation6], 0 }
   0x2   :  { %14 = vsyncpa [#allocation9], 0 }
   0x3   :  { %15 = vsyncpa [#allocation12], 0 }
   0x4   :  { %16 = vsyncpa [#allocation4], 0  ;;  %s693_s24 = smov [#allocation5]   ;;  %s694_s26 = smov [#allocation8]  }
   0x5   :  { %s34_s25 = sshll.u32 %s693_s24, 4  ;;  %s56_s27 = sshll.u32 %s694_s26, 4  ;;  %s35_s25 = int_to_ptr.vmem [resolvable:$true] %s34_s25  ;;  %s743_s27 = int_to_ptr.vmem [resolvable:$true] %s56_s27 }
   0x6   :  { %s507_s30 = scalar_lea.hbm %s890_s1, 256 }
   0x7   :  { %p508_p0 = scmp.ne.s32.totalorder %s890_s1, %s507_s30  ;;  %p511_p1 = scmp.lt.u32.totalorder %s507_s30, %s890_s1 }
   0x9   :  { %p513_p2 = pnand %p511_p1, %p508_p0 }
   0xb   :  { %516 = shalt.err (!%p513_p2)
}
   0xc   :  { %s517_s12 = scalar_lea.vmem %s35_s25, 256  ;;  %p522_p4 = scmp.lt.s32.totalorder %s35_s25, %s35_s25 }
   0xd   :  { %p518_p3 = scmp.ne.s32.totalorder %s35_s25, %s517_s12  ;;  %p523_p5 = scmp.lt.s32.totalorder %s517_s12, %s517_s12 }
   0xf   :  { %p524_p6 = por %p523_p5, %p522_p4 }
  0x11   :  { %p525_p7 = pnand %p524_p6, %p518_p3 }
  0x13   :  { %528 = shalt.err (!%p525_p7)
}
  0x14   :  { %s695_s13 = smov 64   ;;  %s696_s14 = smov 4  }
  0x15   :  { %40 = dma.hbm_to_vmem [thread:$0]  %s890_s1, 256, %s35_s25, [#allocation6], %s695_s13, %s695_s13, %s696_s14  }
  0x16   :  { %s529_s19 = scalar_lea.hbm %s892_s3, 512 }
  0x17   :  { %p530_p8 = scmp.ne.s32.totalorder %s892_s3, %s529_s19  ;;  %p533_p9 = scmp.lt.u32.totalorder %s529_s19, %s892_s3 }
  0x19   :  { %p535_p10 = pnand %p533_p9, %p530_p8 }
  0x1b   :  { %538 = shalt.err (!%p535_p10)
}
  0x1c   :  { %s539_s24 = scalar_lea.vmem %s743_s27, 512  ;;  %p544_p12 = scmp.lt.s32.totalorder %s743_s27, %s743_s27 }
  0x1d   :  { %p540_p11 = scmp.ne.s32.totalorder %s743_s27, %s539_s24  ;;  %p545_p13 = scmp.lt.s32.totalorder %s539_s24, %s539_s24 }
  0x1f   :  { %p546_p0 = por %p545_p13, %p544_p12 }
  0x21   :  { %p547_p1 = pnand %p546_p0, %p540_p11 }
  0x23   :  { %550 = shalt.err (!%p547_p1)
}
  0x24   :  { %62 = dma.hbm_to_vmem [thread:$0]  %s892_s3, 512, %s743_s27, [#allocation9], %s695_s13, %s695_s13, %s696_s14  }
  0x25   :  { %s697_s26 = smov [#allocation11]   ;;  %s698_s29 = smov [#allocation2]  }
  0x26   :  { %s79_s28 = sshll.u32 %s697_s26, 4  ;;  %s22_s30 = sshll.u32 %s698_s29, 4  ;;  %s80_s28 = int_to_ptr.vmem [resolvable:$true] %s79_s28  ;;  %s780_s30 = int_to_ptr.vmem [resolvable:$true] %s22_s30 }
  0x27   :  { %s551_s10 = scalar_lea.hbm %s894_s5, 16 }
  0x28   :  { %p552_p2 = scmp.ne.s32.totalorder %s894_s5, %s551_s10  ;;  %p555_p3 = scmp.lt.u32.totalorder %s551_s10, %s894_s5 }
  0x2a   :  { %p557_p4 = pnand %p555_p3, %p552_p2 }
  0x2c   :  { %560 = shalt.err (!%p557_p4)
}
  0x2d   :  { %s561_s3 = scalar_lea.vmem %s80_s28, 16  ;;  %s565_s27 = scalar_lea.vmem %s80_s28, 32 }
  0x2e   :  { %p562_p5 = scmp.ne.s32.totalorder %s80_s28, %s561_s3  ;;  %p566_p6 = scmp.lt.s32.totalorder %s80_s28, %s80_s28 }
  0x2f   :  { %p567_p7 = scmp.lt.s32.totalorder %s565_s27, %s561_s3 }
  0x31   :  { %p568_p8 = por %p567_p7, %p566_p6 }
  0x33   :  { %p569_p9 = pnand %p568_p8, %p562_p5 }
  0x35   :  { %572 = shalt.err (!%p569_p9)
}
  0x36   :  { %82 = dma.hbm_to_vmem [thread:$0]  %s894_s5, 16, %s80_s28, [#allocation12]  }
  0x37   :  { %s573_s21 = scalar_lea.hbm %s889_s0, 192 }
  0x38   :  { %p574_p10 = scmp.ne.s32.totalorder %s889_s0, %s573_s21  ;;  %p577_p11 = scmp.lt.u32.totalorder %s573_s21, %s889_s0 }
  0x3a   :  { %p579_p12 = pnand %p577_p11, %p574_p10 }
  0x3c   :  { %582 = shalt.err (!%p579_p12)
}
  0x3d   :  { %s583_s25 = scalar_lea.vmem %s780_s30, 192  ;;  %p588_p0 = scmp.lt.s32.totalorder %s780_s30, %s780_s30 }
  0x3e   :  { %p584_p13 = scmp.ne.s32.totalorder %s780_s30, %s583_s25  ;;  %p589_p1 = scmp.lt.s32.totalorder %s583_s25, %s583_s25 }
  0x40   :  { %p590_p2 = por %p589_p1, %p588_p0 }
  0x42   :  { %p591_p3 = pnand %p590_p2, %p584_p13 }
  0x44   :  { %594 = shalt.err (!%p591_p3)
}
  0x45   :  { %28 = dma.hbm_to_vmem [thread:$0]  %s889_s0, 192, %s780_s30, [#allocation3], %s695_s13, %s695_s13, %s696_s14  }
  0x46   :  { %s699_s28 = smov [#allocation7]   ;;  %s700_s8 = smov [#allocation10]  }
  0x47   :  { %s47_s29 = sshll.u32 %s699_s28, 4  ;;  %s69_s9 = sshll.u32 %s700_s8, 4  ;;  %s48_s29 = int_to_ptr.vmem [resolvable:$true] %s47_s29  ;;  %s70_s9 = int_to_ptr.vmem [resolvable:$true] %s69_s9 }
  0x48   :  { %s595_s12 = scalar_lea.hbm %s891_s2, 16 }
  0x49   :  { %p596_p4 = scmp.ne.s32.totalorder %s891_s2, %s595_s12  ;;  %p599_p5 = scmp.lt.u32.totalorder %s595_s12, %s891_s2 }
  0x4b   :  { %p601_p6 = pnand %p599_p5, %p596_p4 }
  0x4d   :  { %604 = shalt.err (!%p601_p6)
}
  0x4e   :  { %s605_s0 = scalar_lea.vmem %s48_s29, 16  ;;  %s609_s30 = scalar_lea.vmem %s48_s29, 32 }
  0x4f   :  { %p606_p7 = scmp.ne.s32.totalorder %s48_s29, %s605_s0  ;;  %p610_p8 = scmp.lt.s32.totalorder %s48_s29, %s48_s29 }
  0x50   :  { %p611_p9 = scmp.lt.s32.totalorder %s609_s30, %s605_s0 }
  0x52   :  { %p612_p10 = por %p611_p9, %p610_p8 }
  0x54   :  { %p613_p11 = pnand %p612_p10, %p606_p7 }
  0x56   :  { %616 = shalt.err (!%p613_p11)
}
  0x57   :  { %50 = dma.hbm_to_vmem [thread:$0]  %s891_s2, 16, %s48_s29, [#allocation6]  }
  0x58   :  { %s617_s21 = scalar_lea.hbm %s893_s4, 16 }
  0x59   :  { %p618_p12 = scmp.ne.s32.totalorder %s893_s4, %s617_s21  ;;  %p621_p13 = scmp.lt.u32.totalorder %s617_s21, %s893_s4 }
  0x5b   :  { %p623_p0 = pnand %p621_p13, %p618_p12 }
  0x5d   :  { %626 = shalt.err (!%p623_p0)
}
  0x5e   :  { %s627_s25 = scalar_lea.vmem %s70_s9, 16  ;;  %s631_s5 = scalar_lea.vmem %s70_s9, 32 }
  0x5f   :  { %p628_p1 = scmp.ne.s32.totalorder %s70_s9, %s627_s25  ;;  %p632_p2 = scmp.lt.s32.totalorder %s70_s9, %s70_s9 }
  0x60   :  { %p633_p3 = scmp.lt.s32.totalorder %s631_s5, %s627_s25 }
  0x62   :  { %p634_p4 = por %p633_p3, %p632_p2 }
  0x64   :  { %p635_p5 = pnand %p634_p4, %p628_p1 }
  0x66   :  { %638 = shalt.err (!%p635_p5)
}
  0x67   :  { %72 = dma.hbm_to_vmem [thread:$0]  %s893_s4, 16, %s70_s9, [#allocation9]  }
  0x68   :  { %s701_s28 = smov [#allocation13]   ;;  %s639_s11 = scalar_lea.hbm %s895_s6, 16 }
  0x69   :  { %s89_s29 = sshll.u32 %s701_s28, 4  ;;  %p640_p6 = scmp.ne.s32.totalorder %s895_s6, %s639_s11  ;;  %s90_s29 = int_to_ptr.vmem [resolvable:$true] %s89_s29 }
  0x6a   :  { %p643_p7 = scmp.lt.u32.totalorder %s639_s11, %s895_s6 }
  0x6c   :  { %p645_p8 = pnand %p643_p7, %p640_p6 }
  0x6e   :  { %648 = shalt.err (!%p645_p8)
}
  0x6f   :  { %s649_s27 = scalar_lea.vmem %s90_s29, 16  ;;  %s653_s4 = scalar_lea.vmem %s90_s29, 32 }
  0x70   :  { %p650_p9 = scmp.ne.s32.totalorder %s90_s29, %s649_s27  ;;  %p654_p10 = scmp.lt.s32.totalorder %s90_s29, %s90_s29 }
  0x71   :  { %p655_p11 = scmp.lt.s32.totalorder %s653_s4, %s649_s27 }
  0x73   :  { %p656_p12 = por %p655_p11, %p654_p10 }
  0x75   :  { %p657_p13 = pnand %p656_p12, %p650_p9 }
  0x77   :  { %660 = shalt.err (!%p657_p13)
}
  0x78   :  { %92 = dma.hbm_to_vmem [thread:$0]  %s895_s6, 16, %s90_s29, [#allocation12]  }
  0x79   :  { %683 = dma.done.wait [#allocation3], 192  }
  0x7a   :  { %684 = vsyncadd [#allocation3], 4294967104 }
  0x7b   :  { %685 = dma.done.wait [#allocation6], 272  }
  0x7c   :  { %686 = vsyncadd [#allocation6], 4294967024 }
  0x7d   :  { %687 = dma.done.wait [#allocation9], 528  }
  0x7e   :  { %688 = vsyncadd [#allocation9], 4294966768 }
  0x7f   :  { %689 = dma.done.wait [#allocation12], 32  }
  0x80   :  { %690 = vsyncadd [#allocation12], 4294967264  ;;  %v486_v0 = vld [vmem:[#allocation5] sm:$0xff]   ;;  %v487_v1 = vld [vmem:[#allocation5 + $0x8] sm:$0xff]   ;;  %vm148_vm0 = vcmask 261120   ;;  %v124_v9 = vlaneseq  ;;  %vm270_vm1 = vcmask 523264  }
  0x81   :  { %456 = vmatprep.subr.bf16.mxu0 %v486_v0  ;;  %v850_v2 = vld [vmem:[#allocation2] sm:$0xff]   ;;  %v852_v3 = vld [vmem:[#allocation2 + $0x8] sm:$0x1]  ;;  %v492_v7 = vld [vmem:[#allocation8 + $0x10] sm:$0xff]   ;;  %vm337_vm2 = vcmask 254976   ;;  %vm403_vm3 = vcmask 257024  }
  0x82   :  { %457 = vmatpush3.bf16.msra.mxu0 %v486_v0  ;;  %460 = vmatprep.mubr.msk.bf16.mxu0 %vm148_vm0, %v850_v2  ;;  %v429_v4 = vcombine.low %v852_v3, %v852_v3  ;;  %v490_v5 = vld [vmem:[#allocation8] sm:$0xff]   ;;  %v491_v6 = vld [vmem:[#allocation8 + $0x8] sm:$0xff]   ;;  %v493_v8 = vld [vmem:[#allocation8 + $0x18] sm:$0xff]   ;;  %v125_v10 = vshrl.u32 %v124_v9, 7  ;;  %v327_v54 = vunpack.c.l.bf16 %v852_v3  ;;  %v325_v55 = vunpack.c.l.bf16 %v850_v2  ;;  %s702_s6 = smov [#allocation14]  }
  0x83   :  { %458 = vmatprep.subr.bf16.mxu0 %v487_v1  ;;  %464 = vmatprep.subr.bf16.mxu1 %v490_v5  ;;  %v122_v11 = vld [vmem:[#allocation7] sm:$0x1]  ;;  %v240_v51 = vld [vmem:[#allocation10] sm:$0x1]  ;;  %v326_v59 = vunpack.c.h.bf16 %v850_v2  ;;  %s413_s30 = sshll.u32 %s702_s6, 4  ;;  %vm406_vm4 = vcmask 253952   ;;  %s414_s30 = int_to_ptr.vmem [resolvable:$true] %s413_s30 }
  0x84   :  { %465 = vmatpush3.bf16.msra.mxu1 %v490_v5  ;;  %v123_v12 = vunpack.c.l.bf16 %v122_v11  ;;  %v859_v13 = vsub.s32 0, %v125_v10  ;;  %v241_v52 = vunpack.c.l.bf16 %v240_v51  ;;  %s661_s17 = scalar_lea.vmem %s414_s30, 192  ;;  %p666_p1 = scmp.lt.s32.totalorder %s414_s30, %s414_s30 }
  0x85   :  { %466 = vmatprep.subr.bf16.mxu1 %v491_v6  ;;  %p662_p0 = scmp.ne.s32.totalorder %s414_s30, %s661_s17  ;;  %p667_p2 = scmp.lt.s32.totalorder %s661_s17, %s661_s17 }
  0x86   :  { %459 = vmatpush3.bf16.msra.mxu0 %v487_v1  ;;  %v127_v14 = vrot.slane %v123_v12, %v859_v13  ;;  %v245_v53 = vrot.slane %v241_v52, %v859_v13 }
  0x87   :  { %p668_p3 = por %p667_p2, %p666_p1 }
  0x88   :  { %467 = vmatpush3.bf16.msra.mxu1 %v491_v6 }
  0x89   :  { %461 = vmatmul.mubr.msk.bf16.vlgmr.msra.gmra.mrb[0].mxu0 %vm148_vm0, %v429_v4  ;;  %468 = vmatprep.subr.bf16.mxu1 %v492_v7  ;;  %p669_p4 = pnand %p668_p3, %p662_p0 }
  0x8c   :  { %469 = vmatpush3.bf16.msra.mxu1 %v492_v7 }
  0x8d   :  { %470 = vmatprep.subr.bf16.mxu1 %v493_v8 }
  0x90   :  { %471 = vmatpush3.bf16.msra.mxu1 %v493_v8 }
 0x15c   :  { %v462_v15 = vpop.f32.mrb[0].mxu0 }
 0x15d   :  { %v198_v16 = vadd.f32 %v462_v15, %v127_v14  ;;  %v189_v17 = vpop.f32.mrb[1].mxu0 }
 0x15e   :  { %v190_v18 = vadd.f32 %v189_v17, %v127_v14  ;;  %v463_v19 = vpop.f32.mrb[2].mxu0 }
 0x15f   :  { %v205_v20 = vmul.f32 %v198_v16, %v198_v16  ;;  %v192_v21 = vpop.f32.mrb[3].mxu0 }
 0x160   :  { %v203_v22 = vmul.f32 %v190_v18, %v190_v18  ;;  %v193_v23 = vadd.f32 %v192_v21, %v127_v14 }
 0x161   :  { %v208_v24 = vmul.f32 %v205_v20, %v198_v16 }
 0x162   :  { %v206_v25 = vmul.f32 %v203_v22, %v190_v18  ;;  %v204_v26 = vmul.f32 %v193_v23, %v193_v23 }
 0x163   :  { %v211_v27 = vmul.f32 0.044715, %v208_v24 }
 0x164   :  { %v209_v28 = vmul.f32 0.044715, %v206_v25  ;;  %v207_v29 = vmul.f32 %v204_v26, %v193_v23 }
 0x165   :  { %v214_v30 = vadd.f32 %v211_v27, %v198_v16 }
 0x166   :  { %v212_v31 = vadd.f32 %v209_v28, %v190_v18  ;;  %v210_v32 = vmul.f32 0.044715, %v207_v29 }
 0x167   :  { %v217_v33 = vmul.f32 0.7978846, %v214_v30 }
 0x168   :  { %v215_v34 = vmul.f32 0.7978846, %v212_v31  ;;  %v213_v35 = vadd.f32 %v210_v32, %v193_v23  ;;  %v372_v31 = vld [vmem:[#allocation11] sm:$0x1]  ;;  %v381_v32 = vld [vmem:[#allocation13] sm:$0x1] }
 0x169   :  { %495 = vtanh.f32 %v217_v33  ;;  %v373_v33 = vunpack.c.l.bf16 %v372_v31 }
 0x16a   :  { %v216_v36 = vmul.f32 0.7978846, %v213_v35  ;;  %497 = vtanh.f32 %v215_v34  ;;  %v382_v34 = vunpack.c.l.bf16 %v381_v32 }
 0x16b   :  { %v377_v35 = vrot.slane %v373_v33, %v859_v13 }
 0x16c   :  { %499 = vtanh.f32 %v216_v36 }
 0x173   :  { %v496_v37 = vpop.eup %495 }
 0x174   :  { %v498_v38 = vpop.eup %497  ;;  %v223_v39 = vadd.f32 1.0, %v496_v37 }
 0x175   :  { %v221_v40 = vadd.f32 1.0, %v498_v38  ;;  %v386_v38 = vrot.slane %v382_v34, %v859_v13 }
 0x176   :  { %v500_v41 = vpop.eup %499  ;;  %v226_v42 = vmul.f32 0.5, %v223_v39 }
 0x177   :  { %v222_v43 = vadd.f32 1.0, %v500_v41  ;;  %v224_v44 = vmul.f32 0.5, %v221_v40 }
 0x178   :  { %v229_v46 = vmul.f32 %v226_v42, %v198_v16 }
 0x179   :  { %v225_v45 = vmul.f32 0.5, %v222_v43  ;;  %v227_v47 = vmul.f32 %v224_v44, %v190_v18 }
 0x17a   :  { %v231_v50 = vpack.c.bf16 %v229_v46, %v229_v46 }
 0x17b   :  { %v228_v48 = vmul.f32 %v225_v45, %v193_v23 }
 0x17d   :  { %v230_v49 = vpack.c.bf16 %v228_v48, %v227_v47 }
 0x17f   :  { %472 = vmatprep.mubr.msk.bf16.mxu1 %vm270_vm1, %v230_v49 }
 0x180   :  { %473 = vmatmul.mubr.msk.bf16.vlgmr.msra.gmra.mrb[0].mxu1 %vm270_vm1, %v231_v50 }
 0x253   :  { %v474_v56 = vpop.f32.mrb[0].mxu1 }
 0x254   :  { %v320_v57 = vadd.f32 %v474_v56, %v245_v53  ;;  %v311_v58 = vpop.f32.mrb[1].mxu1 }
 0x255   :  { %v312_v60 = vadd.f32 %v311_v58, %v245_v53  ;;  %v475_v61 = vpop.f32.mrb[2].mxu1 }
 0x256   :  { %v314_v62 = vpop.f32.mrb[3].mxu1  ;;  %v330_v63 = vadd.f32 %v327_v54, %v320_v57 }
 0x257   :  { %v315_v0 = vadd.f32 %v314_v62, %v245_v53  ;;  %v328_v1 = vadd.f32 %v325_v55, %v312_v60 }
 0x258   :  { %v338_v4 = vsel %vm337_vm2, %v330_v63, 0.0 }
 0x259   :  { %339 = vadd.xlane.f32.xlu1 %v338_v4  ;;  %v331_v5 = vsel %vm148_vm0, %v328_v1, 0.0  ;;  %v329_v3 = vadd.f32 %v326_v59, %v315_v0 }
 0x25a   :  { %332 = vadd.xlane.f32.xlu0 %v331_v5 }
 0x25b   :  { %v334_v6 = vsel %vm148_vm0, %v329_v3, 0.0 }
 0x25e   :  { %335 = vadd.xlane.f32.xlu0 %v334_v6 }
 0x2e6   :  { %v340_v7 = vpop.xlane.xlu1 %339 }
 0x2e7   :  { %v344_v8 = vmul.f32 0.03125, %v340_v7  ;;  %v333_v2 = vpop.xlane.xlu0 %332 }
 0x2e8   :  { %v342_v9 = vmul.f32 0.03125, %v333_v2 }
 0x2e9   :  { %v347_v10 = vsub.f32 %v330_v63, %v344_v8 }
 0x2ea   :  { %v345_v11 = vsub.f32 %v328_v1, %v342_v9 }
 0x2eb   :  { %v336_v12 = vpop.xlane.xlu0 %335  ;;  %v350_v18 = vmul.f32 %v347_v10, %v347_v10 }
 0x2ec   :  { %v343_v14 = vmul.f32 0.03125, %v336_v12  ;;  %v348_v15 = vmul.f32 %v345_v11, %v345_v11 }
 0x2ed   :  { %v357_v20 = vsel %vm337_vm2, %v350_v18, 0.0 }
 0x2ee   :  { %v346_v16 = vsub.f32 %v329_v3, %v343_v14  ;;  %v351_v17 = vsel %vm148_vm0, %v348_v15, 0.0 }
 0x2ef   :  { %352 = vadd.xlane.f32.xlu1 %v351_v17 }
 0x2f0   :  { %v349_v19 = vmul.f32 %v346_v16, %v346_v16 }
 0x2f2   :  { %v354_v21 = vsel %vm148_vm0, %v349_v19, 0.0 }
 0x2f3   :  { %358 = vadd.xlane.f32.xlu1 %v357_v20  ;;  %355 = vadd.xlane.f32.xlu0 %v354_v21 }
 0x37c   :  { %v353_v22 = vpop.xlane.xlu1 %352 }
 0x37d   :  { %v360_v23 = vmul.f32 0.03125, %v353_v22 }
 0x37f   :  { %v363_v24 = vadd.f32 1e-05, %v360_v23 }
 0x380   :  { %v359_v25 = vpop.xlane.xlu1 %358  ;;  %v356_v26 = vpop.xlane.xlu0 %355 }
 0x381   :  { %501 = vrsqrt.f32 %v363_v24  ;;  %v362_v27 = vmul.f32 0.03125, %v359_v25  ;;  %v361_v28 = vmul.f32 0.03125, %v356_v26 }
 0x383   :  { %v365_v29 = vadd.f32 1e-05, %v362_v27  ;;  %v364_v30 = vadd.f32 1e-05, %v361_v28 }
 0x385   :  { %503 = vrsqrt.f32 %v365_v29 }
 0x386   :  { %505 = vrsqrt.f32 %v364_v30 }
 0x38b   :  { %v502_v36 = vpop.eup %501 }
 0x38c   :  { %v369_v37 = vmul.f32 %v502_v36, %v345_v11 }
 0x38e   :  { %v378_v39 = vmul.f32 %v377_v35, %v369_v37 }
 0x38f   :  { %v504_v40 = vpop.eup %503 }
 0x390   :  { %v506_v41 = vpop.eup %505  ;;  %v371_v42 = vmul.f32 %v504_v40, %v347_v10  ;;  %v387_v43 = vadd.f32 %v386_v38, %v378_v39 }
 0x391   :  { %v370_v44 = vmul.f32 %v506_v41, %v346_v16 }
 0x392   :  { %v380_v45 = vmul.f32 %v377_v35, %v371_v42  ;;  %v443_v46 = vpack.c.bf16 %v387_v43, %v387_v43 }
 0x393   :  { %v379_v47 = vmul.f32 %v377_v35, %v370_v44 }
 0x394   :  { %v389_v48 = vadd.f32 %v386_v38, %v380_v45  ;;  %404 = vst.msk [vmem:[#allocation14] sm:$0xf] %vm403_vm3, %v443_v46 }
 0x395   :  { %v388_v49 = vadd.f32 %v386_v38, %v379_v47 }
 0x396   :  { %v445_v50 = vpack.c.bf16 %v389_v48, %v389_v48 }
 0x397   :  { %v444_v51 = vpack.c.bf16 %v388_v49, %v388_v49 }
 0x398   :  { %407 = vst.msk [vmem:[#allocation14 + $0x8] sm:$0x1] %vm406_vm4, %v445_v50 }
 0x399   :  { %405 = vst.msk [vmem:[#allocation14 + $0x4] sm:$0xf] %vm403_vm3, %v444_v51 }
 0x39a   :  { %672 = shalt.err (!%p669_p4)
}
 0x39b   :  { %s673_s20 = scalar_lea.hbm %s896_s7, 192 }
 0x39c   :  { %p674_p5 = scmp.ne.s32.totalorder %s896_s7, %s673_s20  ;;  %p677_p6 = scmp.lt.u32.totalorder %s673_s20, %s896_s7 }
 0x39e   :  { %p679_p7 = pnand %p677_p6, %p674_p5 }
 0x3a0   :  { %682 = shalt.err (!%p679_p7)
}
 0x3a1   :  { %419 = dma.vmem_to_hbm [thread:$0]  %s414_s30, 192, %s896_s7, [#allocation4], %s695_s13, %s695_s13, %s696_s14  }
 0x3a2   :  { %691 = dma.done.wait [#allocation4], 192  }
 0x3a3   :  { %692 = vsyncadd [#allocation4], 4294967104 }
 0x3a4   :  { %423 = vsyncpa [#allocation3], 1 }
 0x3a5   :  { %424 = vsyncpa [#allocation6], 1 }
 0x3a6   :  { %425 = vsyncpa [#allocation9], 1 }
 0x3a7   :  { %426 = vsyncpa [#allocation12], 1 }
 0x3a8   :  { %427 = vsyncpa [#allocation4], 1 }

// kernel: vit_forward.9
= control target key start
LH: loop header
LB: loop body
LE: loop exit
PB: predicated region body
PF: predicated region fallthrough
CT: control target
= control target key end

     0   :  { %s2350_s0 = inlined_call_operand.hbm [shape: bf16[2,9,32], index: 0, kind: input, shape index: {}]   ;;  %s2351_s1 = inlined_call_operand.hbm [shape: bf16[2,9,96], index: 1, kind: input, shape index: {}]   ;;  %s2352_s2 = inlined_call_operand.hbm [shape: bf16[32,32], index: 2, kind: input, shape index: {}]   ;;  %s2353_s3 = inlined_call_operand.hbm [shape: bf16[1,32], index: 3, kind: input, shape index: {}]   ;;  %s2354_s4 = inlined_call_operand.hbm [shape: bf16[1,32], index: 4, kind: input, shape index: {}]   ;;  %s2355_s5 = inlined_call_operand.hbm [shape: bf16[1,32], index: 5, kind: input, shape index: {}]   ;;  %s2356_s6 = inlined_call_operand.hbm [shape: bf16[2,9,32], index: 6, kind: output, shape index: {}]  }
   0x1   :  { %2364 = sst [smem:[#allocation20_spill]] %s2350_s0 }
   0x2   :  { %2365 = sst [smem:[#allocation21_spill]] %s2352_s2 }
   0x3   :  { %2366 = sst [smem:[#allocation22_spill]] %s2353_s3 }
   0x4   :  { %11 = vsyncpa [#allocation3], 0 }
   0x5   :  { %13 = vsyncpa [#allocation3 + $0x1], 0 }
   0x6   :  { %14 = vsyncpa [#allocation6], 0 }
   0x7   :  { %16 = vsyncpa [#allocation6 + $0x1], 0 }
   0x8   :  { %17 = vsyncpa [#allocation9], 0 }
   0x9   :  { %18 = vsyncpa [#allocation12], 0 }
   0xa   :  { %19 = vsyncpa [#allocation4], 0 }
   0xb   :  { %21 = vsyncpa [#allocation4 + $0x1], 0  ;;  %s1901_s21 = smov 0   ;;  %s1903_s22 = smov 0  }
   0xc   :  { %s1905_s23 = smov 0   ;;  %s1907_s24 = smov 0  }
   0xd LB: > { %s1922_s25 = sadd.s32 4294967295, %s1840_s24   ;;  %s1298_s26 = sadd.s32 4294967294, %s1840_s24   ;;  %s1840_s24 = sphi %s1907_s24, %s2393_s24   ;;  %s1836_s23 = sphi %s1905_s23, %s2392_s23   ;;  %s1832_s22 = sphi %s1903_s22, %s2391_s22   ;;  %s1828_s21 = sphi %s1901_s21, %s2390_s21  }
   0xe   : > { %p47_p0 = scmp.ne.s32.totalorder %s1832_s22, %s1828_s21  ;;  %p2357_p1 = scmp.eq.s32.totalorder %s1922_s25, 0 }
   0xf   : > { %p187_p3 = scmp.eq.s32.totalorder %s1298_s26, 1  ;;  %p1299_p5 = scmp.ge.s32.totalorder %s1840_s24, 1 }
  0x10   : > { %p1931_p4 = por %p2357_p1, %p47_p0  ;;  %p194_p7 = scmp.lt.s32.totalorder %s1840_s24, 3 }
  0x11   : > { %p1936_p6 = por %p187_p3, %p47_p0  ;;  %s1842_s30 = smov [#allocation7]  }
  0x12   : > { %s2367_s27 = scalar_select %p1931_p4, 1, 0 }
  0x13   : > { %s2368_s28 = scalar_select %p1936_p6, 1, 0 }
  0x14   : > { %p1941_p8 = pnand %p1299_p5, %p194_p7  ;;  %s206_s7 = sshll.u32 %s1842_s30, 4  ;;  %s1945_s7 = int_to_ptr.vmem [resolvable:$true] %s206_s7 }
  0x15   : > { %s1843_s9 = smov [#allocation8]   ;;  %s1844_s11 = smov [#allocation10]  }
  0x16   : > { %s2369_s29 = scalar_select %p1941_p8, 1, 0 }
  0x17   : > { %p1462_p9 = pneg %p1941_p8  ;;  %s220_s10 = sshll.u32 %s1843_s9, 4  ;;  %s1956_s10 = int_to_ptr.vmem [resolvable:$true] %s220_s10 }
  0x18   : > { %s1958_s12 = sshll.u32 %s1844_s11, 4  ;;  %s2371_s2 = sld [smem:[#allocation21_spill]]  ;;  %s232_s12 = int_to_ptr.vmem [resolvable:$true] %s1958_s12 }
  0x19   : > { %p1952_p11 = pnand %p1462_p9, %p2357_p1 }
  0x1b   : > { %p1968_p13 = pneg %p1952_p11 }
  0x1e   : > { %s1586_s15 = scalar_lea.hbm %s2371_s2, 256 }
  0x1f   : > { %p1587_p12 = scmp.ne.s32.totalorder %s2371_s2, %s1586_s15  ;;  %p1593_p5 = scmp.lt.u32.totalorder %s1586_s15, %s2371_s2 }
  0x21   : > { %p1589_p0 = pnand %p1968_p13, %p1587_p12 }
  0x23   : > { %p1590_p3 = pneg %p1589_p0 }
  0x25   : > { %p1595_p7 = pnand %p1593_p5, %p1590_p3 }
  0x27   : > { %1598 = shalt.err (!%p1595_p7)
}
  0x28   : > { %s1599_s26 = scalar_lea.vmem %s1945_s7, 256  ;;  %p1607_p2 = scmp.lt.s32.totalorder %s1945_s7, %s1945_s7 }
  0x29   : > { %p1600_p9 = scmp.ne.s32.totalorder %s1945_s7, %s1599_s26  ;;  %p1608_p6 = scmp.lt.s32.totalorder %s1599_s26, %s1599_s26 }
  0x2b   : > { %p1602_p10 = pnand %p1600_p9, %p1968_p13  ;;  %p1609_p12 = por %p1608_p6, %p1607_p2 }
  0x2d   : > { %p1603_p1 = pneg %p1602_p10 }
  0x2f   : > { %p1610_p0 = pnand %p1609_p12, %p1603_p1 }
  0x31   : > { %1613 = shalt.err (!%p1610_p0)
}
  0x32   : > { %s2360_s30 = smov 64   ;;  %s2362_s9 = smov 4  }
  0x33   : > { %1465 = dma.hbm_to_vmem [thread:$0]  (!%p1952_p11), %s2371_s2, 256, %s1945_s7, [#allocation6], %s2360_s30, %s2360_s30, %s2362_s9  }
  0x34   : > { %s2373_s3 = sld [smem:[#allocation22_spill]] }
  0x3a   : > { %s1614_s16 = scalar_lea.hbm %s2373_s3, 16 }
  0x3b   : > { %p1615_p1 = scmp.ne.s32.totalorder %s2373_s3, %s1614_s16  ;;  %p1621_p10 = scmp.lt.u32.totalorder %s1614_s16, %s2373_s3 }
  0x3d   : > { %p1617_p2 = pnand %p1615_p1, %p1968_p13 }
  0x3f   : > { %p1618_p6 = pneg %p1617_p2 }
  0x41   : > { %p1623_p3 = pnand %p1621_p10, %p1618_p6 }
  0x43   : > { %1626 = shalt.err (!%p1623_p3)
}
  0x44   : > { %s1627_s7 = scalar_lea.vmem %s1956_s10, 16  ;;  %s1634_s11 = scalar_lea.vmem %s1956_s10, 32 }
  0x45   : > { %p1628_p5 = scmp.ne.s32.totalorder %s1956_s10, %s1627_s7  ;;  %p1635_p12 = scmp.lt.s32.totalorder %s1956_s10, %s1956_s10 }
  0x46   : > { %p1636_p0 = scmp.lt.s32.totalorder %s1634_s11, %s1627_s7 }
  0x47   : > { %p1630_p7 = pnand %p1628_p5, %p1968_p13 }
  0x48   : > { %p1637_p1 = por %p1636_p0, %p1635_p12 }
  0x49   : > { %p1631_p9 = pneg %p1630_p7 }
  0x4b   : > { %p1638_p2 = pnand %p1637_p1, %p1631_p9 }
  0x4d   : > { %1641 = shalt.err (!%p1638_p2)
}
  0x4e   : > { %1468 = dma.hbm_to_vmem [thread:$0]  (!%p1952_p11), %s2373_s3, 16, %s1956_s10, [#allocation9]  }
  0x4f   : > { %s1642_s17 = scalar_lea.hbm %s2354_s4, 16 }
  0x50   : > { %p1643_p6 = scmp.ne.s32.totalorder %s2354_s4, %s1642_s17  ;;  %p1649_p5 = scmp.lt.u32.totalorder %s1642_s17, %s2354_s4 }
  0x52   : > { %p1645_p10 = pnand %p1643_p6, %p1968_p13 }
  0x54   : > { %p1646_p3 = pneg %p1645_p10 }
  0x56   : > { %p1651_p7 = pnand %p1649_p5, %p1646_p3 }
  0x58   : > { %1654 = shalt.err (!%p1651_p7)
}
  0x59   : > { %s1655_s11 = scalar_lea.vmem %s232_s12, 16  ;;  %s1662_s10 = scalar_lea.vmem %s232_s12, 32 }
  0x5a   : > { %p1656_p9 = scmp.ne.s32.totalorder %s232_s12, %s1655_s11  ;;  %p1663_p1 = scmp.lt.s32.totalorder %s232_s12, %s232_s12 }
  0x5b   : > { %p1664_p2 = scmp.lt.s32.totalorder %s1662_s10, %s1655_s11 }
  0x5c   : > { %p1658_p12 = pnand %p1656_p9, %p1968_p13 }
  0x5d   : > { %p1665_p4 = por %p1664_p2, %p1663_p1 }
  0x5e   : > { %p1659_p0 = pneg %p1658_p12 }
  0x60   : > { %p1666_p8 = pnand %p1665_p4, %p1659_p0 }
  0x62   : > { %1669 = shalt.err (!%p1666_p8)
}
  0x63   : > { %1471 = dma.hbm_to_vmem [thread:$0]  (!%p1952_p11), %s2354_s4, 16, %s232_s12, [#allocation9]  }
  0x64   : > { %s1847_s15 = smov [#allocation11]   ;;  %s1670_s20 = scalar_lea.hbm %s2355_s5, 16 }
  0x65   : > { %s242_s16 = sshll.u32 %s1847_s15, 4  ;;  %p1671_p6 = scmp.ne.s32.totalorder %s2355_s5, %s1670_s20  ;;  %s243_s16 = int_to_ptr.vmem [resolvable:$true] %s242_s16 }
  0x66   : > { %p1677_p10 = scmp.lt.u32.totalorder %s1670_s20, %s2355_s5 }
  0x67   : > { %p1673_p4 = pnand %p1671_p6, %p1968_p13 }
  0x69   : > { %p1674_p8 = pneg %p1673_p4 }
  0x6b   : > { %p1679_p3 = pnand %p1677_p10, %p1674_p8 }
  0x6d   : > { %1682 = shalt.err (!%p1679_p3)
}
  0x6e   : > { %s1683_s12 = scalar_lea.vmem %s243_s16, 16  ;;  %s1690_s13 = scalar_lea.vmem %s243_s16, 32 }
  0x6f   : > { %p1684_p5 = scmp.ne.s32.totalorder %s243_s16, %s1683_s12  ;;  %p1691_p12 = scmp.lt.s32.totalorder %s243_s16, %s243_s16 }
  0x70   : > { %p1692_p0 = scmp.lt.s32.totalorder %s1690_s13, %s1683_s12 }
  0x71   : > { %p1686_p7 = pnand %p1684_p5, %p1968_p13 }
  0x72   : > { %p1693_p1 = por %p1692_p0, %p1691_p12 }
  0x73   : > { %p1687_p9 = pneg %p1686_p7 }
  0x75   : > { %p1694_p2 = pnand %p1693_p1, %p1687_p9 }
  0x77   : > { %1697 = shalt.err (!%p1694_p2)
}
  0x78   : > { %1474 = dma.hbm_to_vmem [thread:$0]  (!%p1952_p11), %s2355_s5, 16, %s243_s16, [#allocation12]  }
  0x79   : > { %s2054_s18 = sadd.s32 1, %s1840_s24   ;;  %s34_s17 = sadd.s32 1, %s1836_s23 }
  0x7a   : > { %s31_s8 = ssub.s32 %s1840_s24, %s2054_s18  ;;  %p41_p13 = scmp.ne.s32.totalorder %s1836_s23, %s1832_s22 }
  0x7b   : > { %p32_p6 = scmp.eq.s32.totalorder %s31_s8, 0  ;;  %p42_p4 = scmp.eq.s32.totalorder %s1840_s24, 0 }
  0x7c   : > { %p2374_p8 = scmp.eq.s32.totalorder %s1922_s25, 1  ;;  %p1490_p3 = scmp.lt.s32.totalorder %s1840_s24, 2 }
  0x7d   : > { %s2070_s20 = scalar_select %p32_p6, %s1836_s23, %s34_s17  }
  0x7e   : > { %p2064_p10 = por %p2374_p8, %p41_p13  ;;  %p43_p5 = por %p42_p4, %p41_p13 }
  0x7f   : > { %s253_s26 = sand.u32 1, %s1836_s23   ;;  %s1339_s16 = sshll.u32 %s1840_s24, 7 }
  0x80   : > { %s1305_s7 = sshll.u32 %s253_s26, 3  ;;  %s2376_s0 = sld [smem:[#allocation20_spill]] }
  0x81   : > { %s257_s13 = scalar_lea.vmem [#allocation2], %s1305_s7  ;;  %p2081_p11 = pnand %p1490_p3, %p43_p5 }
  0x82   : > { %s264_s14 = sshll.u32 %s257_s13, 4  ;;  %s2088_s11 = scalar_lea.hbm %s2351_s1, %s1339_s16  ;;  %s2079_s14 = int_to_ptr.vmem [resolvable:$true] %s264_s14 }
  0x83   : > { %s278_s10 = scalar_lea.vmem [#allocation5], %s1305_s7  ;;  %s2092_s9 = scalar_lea.sflag [#allocation3], %s253_s26 }
  0x84   : > { %s2090_s30 = sshll.u32 %s278_s10, 4  ;;  %p1700_p9 = pneg %p2081_p11  ;;  %s2124_s30 = int_to_ptr.vmem [resolvable:$true] %s2090_s30 }
  0x86   : > { %s2077_s12 = scalar_lea.hbm %s2376_s0, %s1339_s16  ;;  %s1703_s17 = scalar_lea.hbm %s2376_s0, 256 }
  0x87   : > { %s1698_s13 = scalar_lea.hbm %s2077_s12, 128  ;;  %p1704_p1 = scmp.lt.u32.totalorder %s2077_s12, %s2376_s0 }
  0x88   : > { %p1699_p7 = scmp.ne.s32.totalorder %s2077_s12, %s1698_s13  ;;  %p1705_p2 = scmp.lt.u32.totalorder %s1703_s17, %s1698_s13 }
  0x89   : > { %p1707_p6 = scmp.lt.u32.totalorder %s1698_s13, %s2077_s12 }
  0x8a   : > { %p1701_p12 = pnand %p1700_p9, %p1699_p7  ;;  %p1706_p13 = por %p1705_p2, %p1704_p1 }
  0x8c   : > { %p1702_p0 = pneg %p1701_p12  ;;  %p1708_p4 = por %p1707_p6, %p1706_p13 }
  0x8e   : > { %p1709_p8 = pnand %p1708_p4, %p1702_p0 }
  0x90   : > { %1712 = shalt.err (!%p1709_p8)
}
  0x91   : > { %s1713_s26 = scalar_lea.vmem %s2079_s14, 128  ;;  %s1848_s2 = smov [#allocation2]  }
  0x92   : > { %p1714_p3 = scmp.ne.s32.totalorder %s2079_s14, %s1713_s26  ;;  %s1718_s3 = sshll.u32 %s1848_s2, 4  ;;  %s1719_s3 = int_to_ptr.vmem [resolvable:$false] %s1718_s3 }
  0x93   : > { %s1720_s7 = scalar_lea.vmem %s1719_s3, 256  ;;  %p1721_p12 = scmp.lt.s32.totalorder %s2079_s14, %s1719_s3 }
  0x94   : > { %p1716_p5 = pnand %p1714_p3, %p1700_p9  ;;  %p1722_p1 = scmp.lt.s32.totalorder %s1720_s7, %s1713_s26 }
  0x96   : > { %p1717_p7 = pneg %p1716_p5  ;;  %p1723_p2 = por %p1722_p1, %p1721_p12 }
  0x98   : > { %p1724_p13 = pnand %p1723_p2, %p1717_p7 }
  0x9a   : > { %1727 = shalt.err (!%p1724_p13)
}
  0x9b   : > { %s2378_s10 = smov 4   ;;  %s2379_s13 = smov 64  }
  0x9c   : > { %1478 = dma.hbm_to_vmem [thread:$0]  (!%p2081_p11), %s2077_s12, 128, %s2079_s14, %s2092_s9, %s2379_s13, %s2379_s13, %s2378_s10  }
  0x9d   : > { %s274_s17 = sand.u32 1, %s1840_s24   ;;  %s1728_s16 = scalar_lea.hbm %s2088_s11, 128 }
  0x9e   : > { %s2127_s8 = scalar_lea.sflag [#allocation6], %s274_s17  ;;  %p1729_p0 = scmp.ne.s32.totalorder %s2088_s11, %s1728_s16 }
  0x9f   : > { %s1733_s3 = scalar_lea.hbm %s2351_s1, 256  ;;  %p1734_p8 = scmp.lt.u32.totalorder %s2088_s11, %s2351_s1 }
  0xa0   : > { %p1731_p6 = pnand %p1729_p0, %p1700_p9  ;;  %p1735_p3 = scmp.lt.u32.totalorder %s1733_s3, %s1728_s16 }
  0xa1   : > { %p1737_p7 = scmp.lt.u32.totalorder %s1728_s16, %s2088_s11 }
  0xa2   : > { %p1732_p4 = pneg %p1731_p6  ;;  %p1736_p5 = por %p1735_p3, %p1734_p8 }
  0xa4   : > { %p1738_p12 = por %p1737_p7, %p1736_p5 }
  0xa6   : > { %p1739_p1 = pnand %p1738_p12, %p1732_p4 }
  0xa8   : > { %1742 = shalt.err (!%p1739_p1)
}
  0xa9   : > { %s1743_s9 = scalar_lea.vmem %s2124_s30, 128  ;;  %s1849_s12 = smov [#allocation5]  }
  0xaa   : > { %p1744_p2 = scmp.ne.s32.totalorder %s2124_s30, %s1743_s9  ;;  %s1748_s14 = sshll.u32 %s1849_s12, 4  ;;  %s1749_s14 = int_to_ptr.vmem [resolvable:$false] %s1748_s14 }
  0xab   : > { %s1750_s0 = scalar_lea.vmem %s1749_s14, 256  ;;  %p1751_p6 = scmp.lt.s32.totalorder %s2124_s30, %s1749_s14 }
  0xac   : > { %p1746_p13 = pnand %p1744_p2, %p1700_p9  ;;  %p1752_p8 = scmp.lt.s32.totalorder %s1750_s0, %s1743_s9 }
  0xae   : > { %p1747_p0 = pneg %p1746_p13  ;;  %p1753_p3 = por %p1752_p8, %p1751_p6 }
  0xb0   : > { %p1754_p5 = pnand %p1753_p3, %p1747_p0 }
  0xb2   : > { %1757 = shalt.err (!%p1754_p5)
}
  0xb3   : > { %1481 = dma.hbm_to_vmem [thread:$0]  (!%p2081_p11), %s2088_s11, 128, %s2124_s30, %s2127_s8, %s2379_s13, %s2379_s13, %s2378_s10  }
  0xb4   : > { %p2380_p9 = scmp.ne.s32.totalorder %s2369_s29, 0 }
  0xb5   : > { %s2159_s17 = sand.u32 (!%p2380_p9), 1, %s1832_s22   ;;  %p2381_p4 = scmp.ne.s32.totalorder (!%p2380_p9), %s2367_s27, 0 }
  0xb6   : > { %297 = sbr.rel (%p2380_p9) target bundleno = 3475 (0xd93), region = 44  ;;  %s2162_s16 = sshll.u32 (!%p2380_p9), %s2159_s17, 3 }
  0xb7   : > { %s300_s15 = scalar_lea.sflag (!%p2380_p9), [#allocation3], %s2159_s17  ;;  %s303_s26 = scalar_lea.vmem (!%p2380_p9), [#allocation2], %s2162_s16 }
  0xbd   : > { %1803 = dma.done.wait (%p2381_p4), %s300_s15, 128  }
  0xbe   : > { %1805 = vsyncadd (%p2381_p4), %s300_s15, 4294967168  ;;  %s308_s29 = sand.u32 1, %s1922_s25   ;;  %s312_s11 = scalar_lea.vmem [#allocation5], %s2162_s16 }
  0xbf   : > { %s309_s30 = scalar_lea.sflag [#allocation6], %s308_s29 }
  0xc0   : > { %1807 = dma.done.wait (%p2381_p4), %s309_s30, 128  }
  0xc1   : > { %1809 = vsyncadd (%p2381_p4), %s309_s30, 4294967168  ;;  %p2382_p11 = scmp.eq.s32.totalorder %s1922_s25, 0 }
  0xc3   : > { %1811 = dma.done.wait (%p2382_p11), [#allocation6], 256   ;;  %p2383_p7 = pmov %p2382_p11 }
  0xc5   : > { %1813 = vsyncadd (%p2383_p7), [#allocation6], 4294967040  ;;  %p2384_p12 = pmov %p2383_p7 }
  0xc6   : > { %p2385_p1 = pmov %p2383_p7 }
  0xc7   : > { %1815 = dma.done.wait (%p2384_p12), [#allocation9], 32  }
  0xc8   : > { %1817 = vsyncadd (%p2385_p1), [#allocation9], 4294967264  ;;  %p2386_p2 = pmov %p2385_p1 }
  0xc9   : > { %p2387_p13 = pmov %p2385_p1 }
  0xca   : > { %1819 = dma.done.wait (%p2386_p2), [#allocation12], 16  }
  0xcb   : > { %1821 = vsyncadd (%p2387_p13), [#allocation12], 4294967280  ;;  %v1850_v0 = vmov 0.0   ;;  %vm1851_vm0 = vmmov 0   ;;  %v2194_v1 = vld [vmem:[%s312_s11] sm:$0x1f]  }
  0xcc   : > { %1368 = vmatprep.subr.bf16.mxu0 %v1850_v0  ;;  %1370 = vmatprep.mubr.msk.bf16.mxu0 %vm1851_vm0, %v1850_v0  ;;  %s1852_s27 = smov 96   ;;  %vm378_vm1 = vcmask 64512   ;;  %vm428_vm2 = vcmask 72704   ;;  %vm432_vm3 = vcmask 65536   ;;  %s1853_s10 = smov 64   ;;  %vm458_vm4 = vcmask 1043456  }
  0xcd   : > { %1374 = vmatprep.subr.bf16.mxu1 %v1850_v0  ;;  %1376 = vmatprep.mubr.msk.bf16.mxu1 %vm1851_vm0, %v1850_v0  ;;  %vm459_vm5 = vcmask 1044480   ;;  %v1854_v14 = vmov 65535   ;;  %s1855_s13 = smov 88   ;;  %s1856_s8 = smov 120   ;;  %v368_v60 = vld [vmem:[#allocation7 + $0x4] sm:$0xf] }
  0xce   : > { %376 = vrot.lane.b32.xlu0 %v2194_v1, %s1852_s27  ;;  %v460_v15 = vsel %vm458_vm4, 4294967295, %v1854_v14  ;;  %s1857_s2 = smov 56   ;;  %s1858_s3 = smov 80   ;;  %v637_v61 = vsel %vm458_vm4, %v368_v60, 0  ;;  %v369_v60 = vld [vmem:[#allocation7 + $0x8] sm:$0xf] }
  0xcf   : > { %v2208_v19 = vsel %vm459_vm5, %v460_v15, 0  ;;  %s1859_s7 = smov 112   ;;  %s1860_s9 = smov 48   ;;  %vm1089_vm6 = vcmask 261120   ;;  %vm1093_vm7 = vcmask 253952   ;;  %vm1142_vm10 = vcmask 257024  }
  0xd0   : > { %s1861_s12 = smov 72   ;;  %s1862_s14 = smov 104   ;;  %vm1145_vm8 = vsmask.f32 256 }
  0xd1   : > { %s1863_s0 = smov 40   ;;  %vm1146_vm9 = vmand %vm1093_vm7, %vm1145_vm8  ;;  %s361_s15 = scalar_lea.vmem [#allocation13], %s2162_s16 }
  0xd2   : > { %s1164_s29 = sshll.u32 %s361_s15, 4  ;;  %s1151_s16 = scalar_lea.sflag [#allocation4], %s2159_s17  ;;  %s2304_s29 = int_to_ptr.vmem [resolvable:$true] %s1164_s29 }
 0x140   : > { %v377_v2 = vpop.permute.xlu0 %376 }
 0x141   : > { %v383_v3 = vsel %vm378_vm1, %v377_v2, 0 }
 0x142   : > { %1369 = vmatpush3.bf16.xpose.msra.mxu0 %v383_v3 }
 0x143   : > { %1386 = vmatprep.subr.bf16.mxu0 %v1850_v0 }
 0x149   : > { %1371 = vmatmul.mubr.msk.bf16.vlgmr.msra.gmra.mrb[0].mxu0 %vm378_vm1, %v2194_v1 }
 0x14a   : > { %1388 = vmatprep.mubr.msk.bf16.mxu0 %vm1851_vm0, %v1850_v0 }
 0x21c   : > { %v419_v4 = vpop.f32.mrb[0].mxu0 }
 0x21d   : > { %v426_v5 = vmul.f32 0.35355338, %v419_v4  ;;  %v1372_v6 = vpop.f32.mrb[1].mxu0 }
 0x21e   : > { %v422_v7 = vpop.f32.mrb[2].mxu0  ;;  %v367_v6 = vld [vmem:[#allocation7] sm:$0xf] }
 0x21f   : > { %v427_v8 = vmul.f32 0.35355338, %v422_v7  ;;  %v1373_v9 = vpop.f32.mrb[3].mxu0  ;;  %v429_v10 = vsel %vm428_vm2, %v426_v5, -inf }
 0x220   : > { %430 = vmax.xlane.f32.xlu0 %v429_v10  ;;  %v684_v10 = vsel %vm458_vm4, %v367_v6, 0 }
 0x221   : > { %v433_v11 = vsel %vm432_vm3, %v427_v8, -inf }
 0x222   : > { %434 = vmax.xlane.f32.xlu1 %v433_v11 }
 0x233   : > { %453 = vrot.lane.b32.xlu1 %v2194_v1, %s1853_s10 }
 0x2ad   : > { %v431_v12 = vpop.xlane.xlu0 %430 }
 0x2ae   : > { %v436_v13 = vsub.f32 %v426_v5, %v431_v12 }
 0x2af   : > { %v435_v16 = vpop.xlane.xlu1 %434 }
 0x2b0   : > { %v438_v17 = vmul.f32 1.442695, %v436_v13  ;;  %v437_v18 = vsub.f32 %v427_v8, %v435_v16 }
 0x2b2   : > { %1550 = vpow2.f32 %v438_v17  ;;  %v440_v20 = vmul.f32 1.442695, %v437_v18 }
 0x2b3   : > { %v454_v21 = vpop.permute.xlu1 %453 }
 0x2b4   : > { %1552 = vpow2.f32 %v440_v20  ;;  %v463_v22 = vand.u32 %v2208_v19, %v454_v21 }
 0x2b6   : > { %1375 = vmatpush3.bf16.msra.mxu1 %v463_v22 }
 0x2b7   : > { %1380 = vmatprep.subr.bf16.mxu1 %v1850_v0 }
 0x2bc   : > { %v1551_v23 = vpop.eup %1550 }
 0x2bd   : > { %v442_v24 = vsel %vm428_vm2, %v1551_v23, 0.0 }
 0x2be   : > { %v1553_v25 = vpop.eup %1552  ;;  %443 = vadd.xlane.f32.xlu1 %v442_v24 }
 0x2bf   : > { %v445_v26 = vsel %vm432_vm3, %v1553_v25, 0.0 }
 0x2c2   : > { %446 = vadd.xlane.f32.xlu1 %v445_v26 }
 0x2d3   : > { %509 = vrot.lane.b32.xlu1 %v2194_v1, %s1855_s13  ;;  %s1758_s13 = scalar_lea.vmem %s2304_s29, 128 }
 0x2d4   : > { %p1759_p0 = scmp.ne.s32.totalorder %s2304_s29, %s1758_s13 }
 0x2d6   : > { %p1760_p6 = pnand %p1759_p0, %p2064_p10 }
 0x2d7   : > { %507 = vrot.lane.b32.xlu1 %v2194_v1, %s1856_s8 }
 0x2d8   : > { %p1761_p8 = pneg %p1760_p6 }
 0x34b   : > { %v444_v27 = vpop.xlane.xlu1 %443 }
 0x34c   : > { %1554 = vrcp.f32 %v444_v27 }
 0x34f   : > { %v447_v28 = vpop.xlane.xlu1 %446 }
 0x350   : > { %1556 = vrcp.f32 %v447_v28 }
 0x353   : > { %v510_v31 = vpop.permute.xlu1 %509 }
 0x354   : > { %v515_v34 = vsel %vm378_vm1, %v510_v31, 0 }
 0x356   : > { %v1555_v29 = vpop.eup %1554 }
 0x357   : > { %v450_v32 = vmul.f32 %v1555_v29, %v1551_v23  ;;  %v508_v36 = vpop.permute.xlu1 %507 }
 0x35a   : > { %v1557_v30 = vpop.eup %1556 }
 0x35b   : > { %v451_v33 = vmul.f32 %v1557_v30, %v1553_v25 }
 0x35d   : > { %v452_v35 = vpack.c.bf16 %v451_v33, %v450_v32 }
 0x35f   : > { %1377 = vmatmul.mubr.msk.bf16.vlgmr.msra.gmra.mrb[0].mxu1 %vm428_vm2, %v452_v35 }
 0x360   : > { %1381 = vmatpush3.bf16.xpose.msra.mxu1 %v515_v34  ;;  %1382 = vmatprep.mubr.msk.bf16.mxu1 %vm1851_vm0, %v1850_v0 }
 0x361   : > { %1392 = vmatprep.subr.bf16.mxu1 %v1850_v0 }
 0x367   : > { %1383 = vmatmul.mubr.msk.bf16.vlgmr.msra.gmra.mrb[4].mxu1 %vm378_vm1, %v508_v36 }
 0x368   : > { %1394 = vmatprep.mubr.msk.bf16.mxu1 %vm1851_vm0, %v1850_v0  ;;  %1393 = vmatpush3.bf16.msra.mxu1 %v637_v61  ;;  %v857_v61 = vsel %vm458_vm4, %v369_v60, 0 }
 0x369   : > { %1404 = vmatprep.subr.bf16.mxu1 %v1850_v0 }
 0x432   : > { %v499_v37 = vpop.f32.mrb[0].mxu1 }
 0x433   : > { %v1378_v38 = vpop.f32.mrb[1].mxu1 }
 0x434   : > { %v502_v39 = vpop.f32.mrb[2].mxu1 }
 0x435   : > { %v506_v40 = vpack.c.bf16 %v502_v39, %v499_v37  ;;  %v1379_v41 = vpop.f32.mrb[3].mxu1 }
 0x43a   : > { %v551_v42 = vpop.f32.mrb[4].mxu1 }
 0x43b   : > { %v558_v43 = vmul.f32 0.35355338, %v551_v42  ;;  %v1384_v44 = vpop.f32.mrb[5].mxu1 }
 0x43c   : > { %v554_v45 = vpop.f32.mrb[6].mxu1 }
 0x43d   : > { %v559_v46 = vmul.f32 0.35355338, %v554_v45  ;;  %v1385_v47 = vpop.f32.mrb[7].mxu1  ;;  %v560_v48 = vsel %vm428_vm2, %v558_v43, -inf }
 0x43e   : > { %561 = vmax.xlane.f32.xlu0 %v560_v48 }
 0x43f   : > { %v563_v49 = vsel %vm432_vm3, %v559_v46, -inf }
 0x440   : > { %564 = vmax.xlane.f32.xlu1 %v563_v49 }
 0x4cb   : > { %v562_v50 = vpop.xlane.xlu0 %561 }
 0x4cc   : > { %v566_v51 = vsub.f32 %v558_v43, %v562_v50 }
 0x4cd   : > { %v565_v52 = vpop.xlane.xlu1 %564 }
 0x4ce   : > { %v568_v53 = vmul.f32 1.442695, %v566_v51  ;;  %v567_v54 = vsub.f32 %v559_v46, %v565_v52 }
 0x4d0   : > { %1558 = vpow2.f32 %v568_v53  ;;  %v570_v55 = vmul.f32 1.442695, %v567_v54 }
 0x4d2   : > { %1560 = vpow2.f32 %v570_v55 }
 0x4da   : > { %v1559_v56 = vpop.eup %1558 }
 0x4db   : > { %v572_v57 = vsel %vm428_vm2, %v1559_v56, 0.0 }
 0x4dc   : > { %v1561_v58 = vpop.eup %1560  ;;  %573 = vadd.xlane.f32.xlu0 %v572_v57 }
 0x4dd   : > { %v575_v59 = vsel %vm432_vm3, %v1561_v58, 0.0 }
 0x4e0   : > { %576 = vadd.xlane.f32.xlu0 %v575_v59 }
 0x4f6   : > { %583 = vrot.lane.b32.xlu0 %v2194_v1, %s1857_s2 }
 0x4fa   : > { %729 = vrot.lane.b32.xlu0 %v2194_v1, %s1858_s3 }
 0x4fe   : > { %727 = vrot.lane.b32.xlu0 %v2194_v1, %s1859_s7 }
 0x569   : > { %v574_v62 = vpop.xlane.xlu0 %573 }
 0x56a   : > { %1562 = vrcp.f32 %v574_v62 }
 0x56d   : > { %v577_v63 = vpop.xlane.xlu0 %576 }
 0x56e   : > { %1564 = vrcp.f32 %v577_v63 }
 0x571   : > { %v584_v2 = vpop.permute.xlu0 %583 }
 0x572   : > { %v589_v3 = vand.u32 %v584_v2, %v2208_v19 }
 0x574   : > { %1387 = vmatpush3.bf16.msra.mxu0 %v589_v3  ;;  %v1563_v4 = vpop.eup %1562 }
 0x575   : > { %1398 = vmatprep.subr.bf16.mxu0 %v1850_v0  ;;  %v580_v7 = vmul.f32 %v1563_v4, %v1559_v56  ;;  %v730_v12 = vpop.permute.xlu0 %729 }
 0x576   : > { %v735_v16 = vsel %vm378_vm1, %v730_v12, 0 }
 0x578   : > { %v1565_v5 = vpop.eup %1564 }
 0x579   : > { %v581_v8 = vmul.f32 %v1565_v5, %v1561_v58  ;;  %v728_v22 = vpop.permute.xlu0 %727 }
 0x57b   : > { %v582_v9 = vpack.c.bf16 %v581_v8, %v580_v7 }
 0x57d   : > { %1389 = vmatmul.mubr.msk.bf16.vlgmr.msra.gmra.mrb[4].mxu0 %vm428_vm2, %v582_v9 }
 0x57e   : > { %1399 = vmatpush3.bf16.msra.mxu0 %v684_v10  ;;  %1400 = vmatprep.mubr.msk.bf16.mxu0 %vm1851_vm0, %v1850_v0 }
 0x57f   : > { %1410 = vmatprep.subr.bf16.mxu0 %v1850_v0 }
 0x585   : > { %1401 = vmatmul.mubr.msk.bf16.vlgmr.msra.gmra.mrb[8].mxu0 %vm378_vm1, %v506_v40 }
 0x586   : > { %1412 = vmatprep.mubr.msk.bf16.mxu0 %vm1851_vm0, %v1850_v0 }
 0x650   : > { %v625_v11 = vpop.f32.mrb[4].mxu0 }
 0x651   : > { %v1390_v13 = vpop.f32.mrb[5].mxu0 }
 0x652   : > { %v628_v14 = vpop.f32.mrb[6].mxu0 }
 0x653   : > { %v632_v15 = vpack.c.bf16 %v628_v14, %v625_v11  ;;  %v1391_v17 = vpop.f32.mrb[7].mxu0 }
 0x655   : > { %1395 = vmatmul.mubr.msk.bf16.vlgmr.msra.gmra.mrb[8].mxu1 %vm378_vm1, %v632_v15 }
 0x656   : > { %1405 = vmatpush3.bf16.xpose.msra.mxu1 %v735_v16  ;;  %1406 = vmatprep.mubr.msk.bf16.mxu1 %vm1851_vm0, %v1850_v0 }
 0x657   : > { %1416 = vmatprep.subr.bf16.mxu1 %v1850_v0 }
 0x658   : > { %v720_v18 = vpop.f32.mrb[8].mxu0 }
 0x659   : > { %v1402_v20 = vpop.f32.mrb[9].mxu0 }
 0x65a   : > { %v723_v21 = vpop.f32.mrb[10].mxu0 }
 0x65b   : > { %v1403_v23 = vpop.f32.mrb[11].mxu0 }
 0x65c   : > { %v370_v23 = vld [vmem:[#allocation7 + $0xc] sm:$0xf] }
 0x65d   : > { %1407 = vmatmul.mubr.msk.bf16.vlgmr.msra.gmra.mrb[12].mxu1 %vm378_vm1, %v728_v22 }
 0x65e   : > { %1418 = vmatprep.mubr.msk.bf16.mxu1 %vm1851_vm0, %v1850_v0  ;;  %1417 = vmatpush3.bf16.msra.mxu1 %v857_v61 }
 0x65f   : > { %1428 = vmatprep.subr.bf16.mxu1 %v1850_v0 }
 0x728   : > { %v673_v24 = vpop.f32.mrb[8].mxu1 }
 0x729   : > { %v2251_v25 = vadd.f32 %v720_v18, %v673_v24  ;;  %v1396_v26 = vpop.f32.mrb[9].mxu1  ;;  %v1032_v24 = vsel %vm458_vm4, %v370_v23, 0 }
 0x72a   : > { %v676_v27 = vpop.f32.mrb[10].mxu1 }
 0x72b   : > { %v2253_v28 = vadd.f32 %v723_v21, %v676_v27  ;;  %v1397_v29 = vpop.f32.mrb[11].mxu1 }
 0x730   : > { %v771_v30 = vpop.f32.mrb[12].mxu1 }
 0x731   : > { %v778_v31 = vmul.f32 0.35355338, %v771_v30  ;;  %v1408_v32 = vpop.f32.mrb[13].mxu1 }
 0x732   : > { %v774_v33 = vpop.f32.mrb[14].mxu1 }
 0x733   : > { %v779_v34 = vmul.f32 0.35355338, %v774_v33  ;;  %v1409_v35 = vpop.f32.mrb[15].mxu1  ;;  %v780_v36 = vsel %vm428_vm2, %v778_v31, -inf }
 0x734   : > { %781 = vmax.xlane.f32.xlu1 %v780_v36 }
 0x735   : > { %v783_v37 = vsel %vm432_vm3, %v779_v34, -inf }
 0x736   : > { %784 = vmax.xlane.f32.xlu0 %v783_v37 }
 0x745   : > { %803 = vrot.lane.b32.xlu1 %v2194_v1, %s1860_s9 }
 0x7c1   : > { %v782_v38 = vpop.xlane.xlu1 %781 }
 0x7c2   : > { %v786_v39 = vsub.f32 %v778_v31, %v782_v38 }
 0x7c3   : > { %v785_v40 = vpop.xlane.xlu0 %784 }
 0x7c4   : > { %v788_v41 = vmul.f32 1.442695, %v786_v39  ;;  %v787_v42 = vsub.f32 %v779_v34, %v785_v40 }
 0x7c5   : > { %v804_v43 = vpop.permute.xlu1 %803 }
 0x7c6   : > { %1566 = vpow2.f32 %v788_v41  ;;  %v790_v44 = vmul.f32 1.442695, %v787_v42  ;;  %v809_v45 = vand.u32 %v804_v43, %v2208_v19 }
 0x7c8   : > { %1568 = vpow2.f32 %v790_v44  ;;  %1411 = vmatpush3.bf16.msra.mxu0 %v809_v45  ;;  %v1079_v44 = vlaneseq }
 0x7c9   : > { %1422 = vmatprep.subr.bf16.mxu0 %v1850_v0 }
 0x7ca   : > { %v1080_v45 = vshrl.u32 %v1079_v44, 7 }
 0x7d0   : > { %v1567_v46 = vpop.eup %1566 }
 0x7d1   : > { %v792_v47 = vsel %vm428_vm2, %v1567_v46, 0.0 }
 0x7d2   : > { %v1569_v48 = vpop.eup %1568  ;;  %793 = vadd.xlane.f32.xlu1 %v792_v47  ;;  %v1081_v47 = vsub.s32 0, %v1080_v45 }
 0x7d3   : > { %v795_v49 = vsel %vm432_vm3, %v1569_v48, 0.0 }
 0x7d6   : > { %796 = vadd.xlane.f32.xlu1 %v795_v49 }
 0x7e7   : > { %904 = vrot.lane.b32.xlu1 %v2194_v1, %s1861_s12 }
 0x7eb   : > { %902 = vrot.lane.b32.xlu1 %v2194_v1, %s1862_s14 }
 0x85f   : > { %v794_v50 = vpop.xlane.xlu1 %793 }
 0x860   : > { %1570 = vrcp.f32 %v794_v50 }
 0x863   : > { %v797_v51 = vpop.xlane.xlu1 %796 }
 0x864   : > { %1572 = vrcp.f32 %v797_v51  ;;  %v364_v51 = vld [vmem:[%s303_s26 + $0x4] sm:$0x1] }
 0x867   : > { %v905_v54 = vpop.permute.xlu1 %904 }
 0x868   : > { %v910_v57 = vsel %vm378_vm1, %v905_v54, 0 }
 0x86a   : > { %v1571_v52 = vpop.eup %1570 }
 0x86b   : > { %v800_v55 = vmul.f32 %v1571_v52, %v1567_v46  ;;  %v903_v59 = vpop.permute.xlu1 %902 }
 0x86e   : > { %v1573_v53 = vpop.eup %1572 }
 0x86f   : > { %v801_v56 = vmul.f32 %v1573_v53, %v1569_v48  ;;  %v363_v48 = vld [vmem:[%s303_s26] sm:$0xf]  ;;  %s1343_s26 = sshll.u32 %s1922_s25, 7  ;;  %s1864_s25 = smov [#allocation13]  }
 0x870   : > { %v1085_v54 = vunpack.c.l.bf16 %v363_v48  ;;  %s2302_s27 = scalar_lea.hbm %s2356_s6, %s1343_s26  ;;  %s1762_s8 = sshll.u32 %s1864_s25, 4  ;;  %s1763_s8 = int_to_ptr.vmem [resolvable:$false] %s1762_s8 }
 0x871   : > { %v802_v58 = vpack.c.bf16 %v801_v56, %v800_v55  ;;  %s1764_s2 = scalar_lea.vmem %s1763_s8, 256  ;;  %p1765_p3 = scmp.lt.s32.totalorder %s2304_s29, %s1763_s8 }
 0x872   : > { %p1766_p5 = scmp.lt.s32.totalorder %s1764_s2, %s1758_s13 }
 0x873   : > { %1413 = vmatmul.mubr.msk.bf16.vlgmr.msra.gmra.mrb[12].mxu0 %vm428_vm2, %v802_v58 }
 0x874   : > { %1423 = vmatpush3.bf16.xpose.msra.mxu0 %v910_v57  ;;  %1424 = vmatprep.mubr.msk.bf16.mxu0 %vm1851_vm0, %v1850_v0  ;;  %p1767_p9 = por %p1766_p5, %p1765_p3 }
 0x875   : > { %1434 = vmatprep.subr.bf16.mxu0 %v1850_v0 }
 0x876   : > { %p1768_p4 = pnand %p1767_p9, %p1761_p8 }
 0x87b   : > { %1425 = vmatmul.mubr.msk.bf16.vlgmr.msra.gmra.mrb[16].mxu0 %vm378_vm1, %v903_v59  ;;  %v1086_v59 = vunpack.c.l.bf16 %v364_v51 }
 0x87c   : > { %1436 = vmatprep.mubr.msk.bf16.mxu0 %vm1851_vm0, %v1850_v0  ;;  %1435 = vmatpush3.bf16.msra.mxu0 %v1032_v24 }
 0x946   : > { %v845_v62 = vpop.f32.mrb[12].mxu0 }
 0x947   : > { %v1414_v63 = vpop.f32.mrb[13].mxu0 }
 0x948   : > { %v848_v2 = vpop.f32.mrb[14].mxu0 }
 0x949   : > { %v852_v3 = vpack.c.bf16 %v848_v2, %v845_v62  ;;  %v1415_v4 = vpop.f32.mrb[15].mxu0 }
 0x94b   : > { %1419 = vmatmul.mubr.msk.bf16.vlgmr.msra.gmra.mrb[16].mxu1 %vm378_vm1, %v852_v3 }
 0x94c   : > { %1430 = vmatprep.mubr.msk.bf16.mxu1 %vm1851_vm0, %v1850_v0 }
 0x94e   : > { %v946_v5 = vpop.f32.mrb[16].mxu0 }
 0x94f   : > { %v953_v6 = vmul.f32 0.35355338, %v946_v5  ;;  %v1426_v7 = vpop.f32.mrb[17].mxu0 }
 0x950   : > { %v949_v8 = vpop.f32.mrb[18].mxu0 }
 0x951   : > { %v954_v9 = vmul.f32 0.35355338, %v949_v8  ;;  %v1427_v10 = vpop.f32.mrb[19].mxu0  ;;  %v955_v11 = vsel %vm428_vm2, %v953_v6, -inf }
 0x952   : > { %956 = vmax.xlane.f32.xlu0 %v955_v11 }
 0x953   : > { %v958_v12 = vsel %vm432_vm3, %v954_v9, -inf }
 0x954   : > { %959 = vmax.xlane.f32.xlu1 %v958_v12 }
 0x9df   : > { %v957_v13 = vpop.xlane.xlu0 %956 }
 0x9e0   : > { %v961_v14 = vsub.f32 %v953_v6, %v957_v13 }
 0x9e1   : > { %v960_v15 = vpop.xlane.xlu1 %959 }
 0x9e2   : > { %v963_v16 = vmul.f32 1.442695, %v961_v14  ;;  %v962_v17 = vsub.f32 %v954_v9, %v960_v15 }
 0x9e4   : > { %1574 = vpow2.f32 %v963_v16  ;;  %v965_v18 = vmul.f32 1.442695, %v962_v17 }
 0x9e6   : > { %1576 = vpow2.f32 %v965_v18  ;;  %v1118_v18 = vld [vmem:[#allocation10] sm:$0x1] }
 0x9ee   : > { %v1575_v0 = vpop.eup %1574 }
 0x9ef   : > { %v967_v20 = vsel %vm428_vm2, %v1575_v0, 0.0 }
 0x9f0   : > { %v1577_v21 = vpop.eup %1576  ;;  %968 = vadd.xlane.f32.xlu0 %v967_v20  ;;  %v1126_v20 = vld [vmem:[#allocation11] sm:$0x1] }
 0x9f1   : > { %v970_v22 = vsel %vm432_vm3, %v1577_v21, 0.0 }
 0x9f4   : > { %971 = vadd.xlane.f32.xlu0 %v970_v22  ;;  %v1127_v22 = vunpack.c.l.bf16 %v1126_v20 }
 0xa0a   : > { %978 = vrot.lane.b32.xlu0 %v2194_v1, %s1863_s0 }
 0xa1e   : > { %v893_v26 = vpop.f32.mrb[16].mxu1 }
 0xa1f   : > { %v900_v27 = vadd.f32 %v893_v26, %v2251_v25  ;;  %v1420_v29 = vpop.f32.mrb[17].mxu1  ;;  %v1131_v26 = vrot.slane %v1127_v22, %v1081_v47 }
 0xa20   : > { %v896_v30 = vpop.f32.mrb[18].mxu1 }
 0xa21   : > { %v901_v31 = vadd.f32 %v896_v30, %v2253_v28  ;;  %v1421_v32 = vpop.f32.mrb[19].mxu1 }
 0xa7d   : > { %v969_v33 = vpop.xlane.xlu0 %968 }
 0xa7e   : > { %1578 = vrcp.f32 %v969_v33  ;;  %v1147_v33 = vld [vmem:[%s361_s15 + $0x4] sm:$0x1] }
 0xa81   : > { %v972_v34 = vpop.xlane.xlu0 %971 }
 0xa82   : > { %1580 = vrcp.f32 %v972_v34 }
 0xa85   : > { %v979_v35 = vpop.permute.xlu0 %978 }
 0xa86   : > { %v984_v36 = vand.u32 %v979_v35, %v2208_v19  ;;  %v1077_v19 = vld [vmem:[#allocation8] sm:$0x1] }
 0xa87   : > { %v1078_v46 = vunpack.c.l.bf16 %v1077_v19 }
 0xa88   : > { %1429 = vmatpush3.bf16.msra.mxu1 %v984_v36  ;;  %v1579_v1 = vpop.eup %1578 }
 0xa89   : > { %v975_v38 = vmul.f32 %v1579_v1, %v1575_v0  ;;  %v1082_v49 = vrot.slane %v1078_v46, %v1081_v47 }
 0xa8c   : > { %v1581_v37 = vpop.eup %1580 }
 0xa8d   : > { %v976_v39 = vmul.f32 %v1581_v37, %v1577_v21  ;;  %v1119_v21 = vunpack.c.l.bf16 %v1118_v18 }
 0xa8f   : > { %v977_v40 = vpack.c.bf16 %v976_v39, %v975_v38  ;;  %v1123_v23 = vrot.slane %v1119_v21, %v1081_v47 }
 0xa91   : > { %1431 = vmatmul.mubr.msk.bf16.vlgmr.msra.gmra.mrb[20].mxu1 %vm428_vm2, %v977_v40 }
 0xb64   : > { %v1020_v25 = vpop.f32.mrb[20].mxu1 }
 0xb65   : > { %v1432_v28 = vpop.f32.mrb[21].mxu1 }
 0xb66   : > { %v1023_v41 = vpop.f32.mrb[22].mxu1 }
 0xb67   : > { %v1027_v42 = vpack.c.bf16 %v1023_v41, %v1020_v25  ;;  %v1433_v43 = vpop.f32.mrb[23].mxu1 }
 0xb69   : > { %1437 = vmatmul.mubr.msk.bf16.vlgmr.msra.gmra.mrb[20].mxu0 %vm378_vm1, %v1027_v42 }
 0xc3c   : > { %v1068_v50 = vpop.f32.mrb[20].mxu0 }
 0xc3d   : > { %v1075_v52 = vadd.f32 %v1068_v50, %v900_v27  ;;  %v1438_v53 = vpop.f32.mrb[21].mxu0 }
 0xc3e   : > { %v1071_v55 = vpop.f32.mrb[22].mxu0 }
 0xc3f   : > { %v1083_v56 = vadd.f32 %v1082_v49, %v1075_v52  ;;  %v1076_v57 = vadd.f32 %v1071_v55, %v901_v31  ;;  %v1439_v58 = vpop.f32.mrb[23].mxu0 }
 0xc41   : > { %v1084_v60 = vadd.f32 %v1082_v49, %v1076_v57  ;;  %v1087_v61 = vadd.f32 %v1085_v54, %v1083_v56 }
 0xc43   : > { %v1090_v62 = vsel %vm1089_vm6, %v1087_v61, 0.0  ;;  %v1088_v63 = vadd.f32 %v1086_v59, %v1084_v60 }
 0xc44   : > { %1091 = vadd.xlane.f32.xlu1 %v1090_v62 }
 0xc45   : > { %v1094_v2 = vsel %vm1093_vm7, %v1088_v63, 0.0 }
 0xc46   : > { %1095 = vadd.xlane.f32.xlu0 %v1094_v2 }
 0xcd1   : > { %v1092_v3 = vpop.xlane.xlu1 %1091 }
 0xcd2   : > { %v1098_v4 = vmul.f32 0.03125, %v1092_v3 }
 0xcd3   : > { %v1096_v5 = vpop.xlane.xlu0 %1095 }
 0xcd4   : > { %v1099_v6 = vmul.f32 0.03125, %v1096_v5  ;;  %v1100_v7 = vsub.f32 %v1087_v61, %v1098_v4 }
 0xcd6   : > { %v1101_v8 = vsub.f32 %v1088_v63, %v1099_v6  ;;  %v1102_v11 = vmul.f32 %v1100_v7, %v1100_v7 }
 0xcd8   : > { %v1103_v9 = vmul.f32 %v1101_v8, %v1101_v8  ;;  %v1104_v12 = vsel %vm1089_vm6, %v1102_v11, 0.0 }
 0xcda   : > { %v1107_v10 = vsel %vm1093_vm7, %v1103_v9, 0.0 }
 0xcdb   : > { %1108 = vadd.xlane.f32.xlu1 %v1107_v10 }
 0xcdf   : > { %1105 = vadd.xlane.f32.xlu1 %v1104_v12 }
 0xd68   : > { %v1109_v13 = vpop.xlane.xlu1 %1108 }
 0xd69   : > { %v1111_v14 = vmul.f32 0.03125, %v1109_v13 }
 0xd6b   : > { %v1113_v15 = vadd.f32 1e-05, %v1111_v14 }
 0xd6c   : > { %v1106_v16 = vpop.xlane.xlu1 %1105 }
 0xd6d   : > { %1582 = vrsqrt.f32 %v1113_v15  ;;  %v1110_v17 = vmul.f32 0.03125, %v1106_v16 }
 0xd6f   : > { %v1112_v0 = vadd.f32 1e-05, %v1110_v17 }
 0xd71   : > { %1584 = vrsqrt.f32 %v1112_v0 }
 0xd77   : > { %v1583_v24 = vpop.eup %1582 }
 0xd78   : > { %v1117_v27 = vmul.f32 %v1583_v24, %v1101_v8 }
 0xd7a   : > { %v1125_v29 = vmul.f32 %v1123_v23, %v1117_v27 }
 0xd7b   : > { %v1585_v30 = vpop.eup %1584 }
 0xd7c   : > { %v1133_v31 = vadd.f32 %v1131_v26, %v1125_v29  ;;  %v1116_v32 = vmul.f32 %v1585_v30, %v1100_v7 }
 0xd7e   : > { %v1342_v34 = vpack.c.bf16 %v1133_v31, %v1133_v31  ;;  %v1124_v35 = vmul.f32 %v1123_v23, %v1116_v32 }
 0xd80   : > { %v1132_v36 = vadd.f32 %v1131_v26, %v1124_v35  ;;  %v1148_v1 = vsel %vm1146_vm9, %v1342_v34, %v1147_v33 }
 0xd81   : > { %1149 = vst [vmem:[%s361_s15 + $0x4] sm:$0x1] %v1148_v1 }
 0xd82   : > { %v1341_v37 = vpack.c.bf16 %v1132_v36, %v1132_v36 }
 0xd84   : > { %1143 = vst.msk [vmem:[%s361_s15] sm:$0xf] %vm1142_vm10, %v1341_v37 }
 0xd85   : > { %1771 = shalt.err (!%p1768_p4)
}
 0xd86   : > { %s1772_s3 = scalar_lea.hbm %s2302_s27, 128  ;;  %s1776_s12 = scalar_lea.hbm %s2356_s6, 256 }
 0xd87   : > { %p1773_p11 = scmp.ne.s32.totalorder %s2302_s27, %s1772_s3  ;;  %p1777_p1 = scmp.lt.u32.totalorder %s2302_s27, %s2356_s6 }
 0xd88   : > { %p1778_p2 = scmp.lt.u32.totalorder %s1776_s12, %s1772_s3  ;;  %p1780_p0 = scmp.lt.u32.totalorder %s1772_s3, %s2302_s27 }
 0xd89   : > { %p1774_p7 = pnand %p1773_p11, %p2064_p10 }
 0xd8a   : > { %p1779_p13 = por %p1778_p2, %p1777_p1 }
 0xd8b   : > { %p1775_p12 = pneg %p1774_p7 }
 0xd8c   : > { %p1781_p6 = por %p1780_p0, %p1779_p13 }
 0xd8e   : > { %p1782_p8 = pnand %p1781_p6, %p1775_p12 }
 0xd90   : > { %1785 = shalt.err (!%p1782_p8)
}
 0xd91   : > { %s1865_s15 = smov 4  }
 0xd92   : > { %1460 = dma.vmem_to_hbm [thread:$0]  (%p2064_p10), %s2304_s29, 128, %s2302_s27, %s1151_s16, %s1853_s10, %s1853_s10, %s1865_s15  }
 0xd93 PF: > { %s1179_s26 = sand.u32 1, %s1828_s21   ;;  %p2388_p3 = scmp.ne.s32.totalorder %s2368_s28, 0 }
 0xd94   : > { %p2389_p5 = scmp.ge.s32.totalorder %s1840_s24, 2  ;;  %s1180_s30 = scalar_lea.sflag [#allocation4], %s1179_s26 }
 0xd96   : > { %p1483_p9 = pnand %p2389_p5, %p2388_p3 }
 0xd98   : > { %1823 = dma.done.wait (!%p1483_p9), %s1180_s30, 128  }
 0xd99   : > { %1825 = vsyncadd (!%p1483_p9), %s1180_s30, 4294967168  ;;  %p24_p4 = scmp.ge.s32.totalorder %s2054_s18, 4   ;;  %s2390_s21 = smov %s1832_s22 }
 0xd9a   : > { %s2391_s22 = smov %s1836_s23  ;;  %s2392_s23 = smov %s2070_s20 }
 0xd9b   : > { %s2393_s24 = smov %s2054_s18  ;;  %26 = sbr.rel (!%p24_p4) target bundleno = 13 (0xd), region = 118 }
 0xda2   :  { %1185 = vsyncpa [#allocation3], 1 }
 0xda3   :  { %1187 = vsyncpa [#allocation3 + $0x1], 1 }
 0xda4   :  { %1188 = vsyncpa [#allocation6], 1 }
 0xda5   :  { %1190 = vsyncpa [#allocation6 + $0x1], 1 }
 0xda6   :  { %1191 = vsyncpa [#allocation9], 1 }
 0xda7   :  { %1192 = vsyncpa [#allocation12], 1 }
 0xda8   :  { %1193 = vsyncpa [#allocation4], 1 }
 0xda9   :  { %1195 = vsyncpa [#allocation4 + $0x1], 1 }

</bundles_post_ra>
